<compile_context>
chip_gen: v5e
topology: v5e:2x2
jax: 0.10.0
libtpu: 0.0.40
codegen_flags: <defaults>
</compile_context>

<pallas_src>
import functools
import math

import jax
import jax.numpy as jnp
from jax.experimental import pallas as pl
from jax.experimental.pallas import tpu as pltpu

INF = 1e20  # matches the module's INF; markoff_value = -INF for 'attention'


def _round_up(x, m):
    return ((x + m - 1) // m) * m


def _graph_learner_kernel(f_all_ref, *out_refs, inv_num_pers, top_k, n_valid,
                          tile_n, with_att):
    """One tile_n-row block of the learned adjacency.

    f_all_ref : (n_pad, k_pad)   F = relu(X @ W_cat); constant block -> 1 DMA
    out_refs  : [att_ref (tile_n, n_pad)]  only when with_att
                 adj_ref (tile_n, n_pad)   row-softmaxed KNN adjacency
    """
    if with_att:
        att_ref, adj_ref = out_refs
    else:
        (adj_ref,) = out_refs

    i = pl.program_id(0)
    row0 = pl.multiple_of(i * tile_n, tile_n)

    f_all = f_all_ref[...]                       # (n_pad, k_pad) f32
    f_blk = f_all_ref[pl.ds(row0, tile_n), :]    # (tile_n, k_pad) f32

    # attention = (1/P) * F_blk @ F_all^T  -- a single deep-K MXU matmul.
    att = jax.lax.dot_general(
        f_blk, f_all, (((1,), (1,)), ((), ())),
        preferred_element_type=jnp.float32) * inv_num_pers

    if with_att:
        att_ref[...] = att

    # Mask padded columns so they never enter the top-k / softmax, then stash
    # the masked attention in adj_ref so the threshold search carries only a
    # (tile_n, 1) vector (caps live full-width temporaries).
    col = jax.lax.broadcasted_iota(jnp.int32, att.shape, 1)
    att = jnp.where(col < n_valid, att, -INF)
    adj_ref[...] = att
    m = jnp.max(att, axis=-1, keepdims=True)     # row max == softmax max

    # Per-row k-th largest value via iterative max (top_k small & static).
    def kth_body(_, kth):
        cur = adj_ref[...]
        return jnp.max(jnp.where(cur >= kth, -jnp.inf, cur),
                       axis=-1, keepdims=True)

    kth = jax.lax.fori_loop(0, top_k - 1, kth_body, m, unroll=True)

    # KNN neighbourhood (markoff_value = -INF) + numerically stable softmax.
    # exp(-INF - m) underflows to 0, so dropped/padded entries contribute 0.
    cur = adj_ref[...]
    e = jnp.where(cur >= kth, jnp.exp(cur - m), 0.0)
    s = jnp.sum(e, axis=-1, keepdims=True)
    adj_ref[...] = e * (1.0 / s)   # narrow reciprocal, wide multiply (no wide divide)


def graph_learner_forward(node_features, weights, *, top_k, tile_n=None,
                          return_attention=False):
    """GraphLearner.forward for metric_type='attention', graph_type='KNN',
    feature_denoise=False.

    node_features : (N, D) float
    weights       : (P, H, D) stacked nn.Linear(D, H, bias=False) weights
    returns (node_features, learned_adj) [, raw_attention]
    """
    N, D = node_features.shape
    P, H, D2 = weights.shape
    assert D2 == D
    top_k = int(min(top_k, N))

    # --- tile_n selection ---------------------------------------------------
    try:
        kind = jax.devices()[0].device_kind.lower()
    except Exception:  # pragma: no cover
        kind = ""
    if tile_n is None:
        # v6e: 256-wide MXU -> fill M with 256-row blocks; others: 128.
        tile_n = 256 if "v6" in kind else 128
        # v7x: 2 TCs share the row grid -> keep >= 4 blocks on small graphs.
        if "v7" in kind:
            while tile_n > 64 and -(-N // tile_n) < 4:
                tile_n //= 2
    tile_n = max(8, (int(tile_n) // 8) * 8)

    # n_pad: multiple of 128 (lane-dense output columns) and of tile_n (rows).
    step = tile_n * 128 // math.gcd(tile_n, 128)
    n_pad = _round_up(max(N, 1), step)
    n_blocks = n_pad // tile_n

    # --- hoisted feature transform: F = relu(X @ W_cat), computed once -------
    # W_cat = [W_1^T | ... | W_P^T] zero-padded to k_pad columns; relu(X @ 0)=0
    # columns contribute nothing to F F^T, so the padding is numerically free.
    k_pad = _round_up(P * H, 128)
    w_cat = jnp.transpose(weights, (2, 0, 1)).reshape(D, P * H)
    w_cat = jnp.pad(w_cat.astype(jnp.float32), ((0, 0), (0, k_pad - P * H)))
    x_pad = jnp.zeros((n_pad, D), jnp.float32).at[:N].set(
        node_features.astype(jnp.float32))
    f_all = jax.nn.relu(jnp.dot(x_pad, w_cat,
                                precision=jax.lax.Precision.HIGHEST))

    # --- explicit VMEM budget -------------------------------------------------
    n_out = 2 if return_attention else 1
    needed = (2 * n_pad * k_pad * 4                 # F_all (+ spare buffer)
              + n_out * 2 * tile_n * n_pad * 4      # double-buffered outputs
              + 4 * tile_n * n_pad * 4              # epilogue temporaries
              + (2 << 20))
    vmem_limit = int(min(max(needed * 5 // 4, 32 << 20), 96 << 20))

    kernel = functools.partial(
        _graph_learner_kernel, inv_num_pers=1.0 / P, top_k=top_k, n_valid=N,
        tile_n=tile_n, with_att=return_attention)

    adj_spec = pl.BlockSpec((tile_n, n_pad), lambda i: (i, 0))
    if return_attention:
        out_shape = (jax.ShapeDtypeStruct((n_pad, n_pad), jnp.float32),
                     jax.ShapeDtypeStruct((n_pad, n_pad), jnp.float32))
        out_specs = [pl.BlockSpec((tile_n, n_pad), lambda i: (i, 0)), adj_spec]
    else:
        out_shape = jax.ShapeDtypeStruct((n_pad, n_pad), jnp.float32)
        out_specs = adj_spec

    out = pl.pallas_call(
        kernel,
        out_shape=out_shape,
        grid=(n_blocks,),
        in_specs=[pl.BlockSpec((n_pad, k_pad), lambda i: (0, 0))],  # 1 DMA
        out_specs=out_specs,
        compiler_params=pltpu.CompilerParams(
            dimension_semantics=("parallel",),
            vmem_limit_bytes=vmem_limit,
        ),
    )(f_all)

    if return_attention:
        att_pad, adj_pad = out
        return node_features, adj_pad[:N, :N], att_pad[:N, :N]
    return node_features, out[:N, :N]


def _reference_attention(x, w):
    """Plain-JAX reference for the multi-head attention matrix."""
    precision = jax.lax.Precision.HIGHEST
    att = jnp.zeros((x.shape[0], x.shape[0]), jnp.float32)
    for p in range(w.shape[0]):
        f = jax.nn.relu(jnp.dot(x, w[p].T, precision=precision))
        att = att + jnp.dot(f, f.T, precision=precision)
    return att / w.shape[0]


if __name__ == "__main__":
    key = jax.random.PRNGKey(0)
    kx, kw = jax.random.split(key)

    N, D, H, P, TOP_K = 250, 32, 32, 2, 8  # emb_dim=hidden=32, num_pers=2

    x = jax.random.normal(kx, (N, D), jnp.float32)
    bound = 1.0 / math.sqrt(D)  # nn.Linear default-style synthetic init
    w = jax.random.uniform(kw, (P, H, D), jnp.float32, minval=-bound,
                           maxval=bound)

    # Default (fast) path: adjacency only (no raw-attention writeback).
    feats, adj = graph_learner_forward(x, w, top_k=TOP_K)
    feats = jax.block_until_ready(feats)
    adj = jax.block_until_ready(adj)

    # Debug path: also return the raw multi-head attention for checking.
    _, adj2, att = graph_learner_forward(x, w, top_k=TOP_K,
                                         return_attention=True)
    adj2 = jax.block_until_ready(adj2)
    att = jax.block_until_ready(att)

    assert feats.shape == (N, D) and adj.shape == (N, N) and att.shape == (N, N)
    assert bool(jnp.all(feats == x))
    assert jnp.allclose(adj, adj2, atol=1e-6, rtol=0), "adj-only path mismatch"

    # 1) multi-head attention matches the plain-JAX reference (matmul tol).
    ref_att = _reference_attention(x, w)
    assert jnp.allclose(att, ref_att, atol=1e-2, rtol=1e-2), "attention mismatch"

    # 2) KNN + softmax stage checked against torch-style topk/scatter applied
    #    to the kernel's own attention values.
    k = min(TOP_K, N)
    vals, idx = jax.lax.top_k(att, k)
    expect = jnp.full((N, N), -INF, jnp.float32)
    expect = expect.at[jnp.arange(N)[:, None], idx].set(vals)
    expect = jax.nn.softmax(expect, axis=-1)
    assert jnp.allclose(adj, expect, atol=1e-5, rtol=1e-5), "KNN/softmax mismatch"

    # 3) each row is a softmax over exactly top_k kept entries.
    assert jnp.allclose(adj.sum(-1), 1.0, atol=1e-5)
    assert bool(jnp.all((adj > 0).sum(-1) == k))

    print("KERNEL_OK")
</pallas_src>

<mosaic_0001>
module attributes {stable_mosaic.version = 11 : i64} {
  func.func @_graph_learner_kernel(%arg0: i32, %arg1: memref<256x128xf32, #tpu.memory_space<vmem>>, %arg2: memref<128x256xf32, #tpu.memory_space<vmem>>) attributes {dimension_semantics = [#tpu.dimension_semantics<parallel>], iteration_bounds = array<i64: 2>, scalar_prefetch = 0 : i64, scratch_operands = 0 : i64, tpu.core_type = #tpu.core_type<tc>, window_params = [{pipeline_mode = #tpu.pipeline_mode<synchronous>, transform_indices = @transform_0, window_bounds = array<i64: 256, 128>}, {transform_indices = @transform_1, window_bounds = array<i64: 128, 256>}]} {
    %c128_i32 = arith.constant 128 : i32
    %0 = arith.muli %arg0, %c128_i32 : i32
    %1 = tpu.assume_multiple %0, 128 : i32
    %c0 = arith.constant 0 : index
    %c0_0 = arith.constant 0 : index
    %2 = vector.load %arg1[%c0, %c0_0] : memref<256x128xf32, #tpu.memory_space<vmem>>, vector<256x128xf32>
    %3 = arith.index_cast %1 : i32 to index
    %c0_1 = arith.constant 0 : index
    %4 = vector.load %arg1[%3, %c0_1] : memref<256x128xf32, #tpu.memory_space<vmem>>, vector<128x128xf32>
    %cst = arith.constant dense<0.000000e+00> : vector<128x256xf32>
    %5 = tpu.matmul %4, %2, %cst {dimension_numbers = #tpu.dot_dimension_numbers<[1], [1], [0], [0], [0, 0, 1, 0], [], []>} : vector<128x128xf32>, vector<256x128xf32>, vector<128x256xf32> -> vector<128x256xf32>
    %cst_2 = arith.constant 5.000000e-01 : f32
    %6 = vector.broadcast %cst_2 : f32 to vector<128x256xf32>
    %7 = arith.mulf %5, %6 : vector<128x256xf32>
    %8 = tpu.iota {dimensions = array<i32: 1>} : vector<128x256xi32>
    %c250_i32 = arith.constant 250 : i32
    %9 = vector.broadcast %c250_i32 : i32 to vector<128x256xi32>
    %10 = arith.cmpi slt, %8, %9 : vector<128x256xi32>
    %cst_3 = arith.constant -1.000000e+20 : f32
    %11 = vector.broadcast %cst_3 : f32 to vector<128x256xf32>
    %12 = arith.select %10, %7, %11 : vector<128x256xi1>, vector<128x256xf32>
    %c0_4 = arith.constant 0 : index
    %c0_5 = arith.constant 0 : index
    %13 = vector.load %arg2[%c0_4, %c0_5] : memref<128x256xf32, #tpu.memory_space<vmem>>, vector<128x256xf32>
    tpu.vector_store %arg2[%c0_4, %c0_5], %12 {strides = array<i32>} : memref<128x256xf32, #tpu.memory_space<vmem>>, vector<128x256xf32>,
    %cst_6 = arith.constant dense<0xFF800000> : vector<128xf32>
    %14 = vector.multi_reduction <maximumf>, %12, %cst_6 [1] : vector<128x256xf32> to vector<128xf32>
    %15 = vector.shape_cast %14 : vector<128xf32> to vector<128x1xf32>
    %c0_i32 = arith.constant 0 : i32
    %c0_7 = arith.constant 0 : index
    %c0_8 = arith.constant 0 : index
    %16 = vector.load %arg2[%c0_7, %c0_8] : memref<128x256xf32, #tpu.memory_space<vmem>>, vector<128x256xf32>
    %17 = vector.broadcast %15 : vector<128x1xf32> to vector<128x256xf32>
    %18 = arith.cmpf oge, %16, %17 : vector<128x256xf32>
    %cst_9 = arith.constant 0xFF800000 : f32
    %19 = vector.broadcast %cst_9 : f32 to vector<128x256xf32>
    %20 = arith.select %18, %19, %16 : vector<128x256xi1>, vector<128x256xf32>
    %cst_10 = arith.constant dense<0xFF800000> : vector<128xf32>
    %21 = vector.multi_reduction <maximumf>, %20, %cst_10 [1] : vector<128x256xf32> to vector<128xf32>
    %22 = vector.shape_cast %21 : vector<128xf32> to vector<128x1xf32>
    %c1_i32 = arith.constant 1 : i32
    %c0_11 = arith.constant 0 : index
    %c0_12 = arith.constant 0 : index
    %23 = vector.load %arg2[%c0_11, %c0_12] : memref<128x256xf32, #tpu.memory_space<vmem>>, vector<128x256xf32>
    %24 = vector.broadcast %22 : vector<128x1xf32> to vector<128x256xf32>
    %25 = arith.cmpf oge, %23, %24 : vector<128x256xf32>
    %cst_13 = arith.constant 0xFF800000 : f32
    %26 = vector.broadcast %cst_13 : f32 to vector<128x256xf32>
    %27 = arith.select %25, %26, %23 : vector<128x256xi1>, vector<128x256xf32>
    %cst_14 = arith.constant dense<0xFF800000> : vector<128xf32>
    %28 = vector.multi_reduction <maximumf>, %27, %cst_14 [1] : vector<128x256xf32> to vector<128xf32>
    %29 = vector.shape_cast %28 : vector<128xf32> to vector<128x1xf32>
    %c2_i32 = arith.constant 2 : i32
    %c0_15 = arith.constant 0 : index
    %c0_16 = arith.constant 0 : index
    %30 = vector.load %arg2[%c0_15, %c0_16] : memref<128x256xf32, #tpu.memory_space<vmem>>, vector<128x256xf32>
    %31 = vector.broadcast %29 : vector<128x1xf32> to vector<128x256xf32>
    %32 = arith.cmpf oge, %30, %31 : vector<128x256xf32>
    %cst_17 = arith.constant 0xFF800000 : f32
    %33 = vector.broadcast %cst_17 : f32 to vector<128x256xf32>
    %34 = arith.select %32, %33, %30 : vector<128x256xi1>, vector<128x256xf32>
    %cst_18 = arith.constant dense<0xFF800000> : vector<128xf32>
    %35 = vector.multi_reduction <maximumf>, %34, %cst_18 [1] : vector<128x256xf32> to vector<128xf32>
    %36 = vector.shape_cast %35 : vector<128xf32> to vector<128x1xf32>
    %c3_i32 = arith.constant 3 : i32
    %c0_19 = arith.constant 0 : index
    %c0_20 = arith.constant 0 : index
    %37 = vector.load %arg2[%c0_19, %c0_20] : memref<128x256xf32, #tpu.memory_space<vmem>>, vector<128x256xf32>
    %38 = vector.broadcast %36 : vector<128x1xf32> to vector<128x256xf32>
    %39 = arith.cmpf oge, %37, %38 : vector<128x256xf32>
    %cst_21 = arith.constant 0xFF800000 : f32
    %40 = vector.broadcast %cst_21 : f32 to vector<128x256xf32>
    %41 = arith.select %39, %40, %37 : vector<128x256xi1>, vector<128x256xf32>
    %cst_22 = arith.constant dense<0xFF800000> : vector<128xf32>
    %42 = vector.multi_reduction <maximumf>, %41, %cst_22 [1] : vector<128x256xf32> to vector<128xf32>
    %43 = vector.shape_cast %42 : vector<128xf32> to vector<128x1xf32>
    %c4_i32 = arith.constant 4 : i32
    %c0_23 = arith.constant 0 : index
    %c0_24 = arith.constant 0 : index
    %44 = vector.load %arg2[%c0_23, %c0_24] : memref<128x256xf32, #tpu.memory_space<vmem>>, vector<128x256xf32>
    %45 = vector.broadcast %43 : vector<128x1xf32> to vector<128x256xf32>
    %46 = arith.cmpf oge, %44, %45 : vector<128x256xf32>
    %cst_25 = arith.constant 0xFF800000 : f32
    %47 = vector.broadcast %cst_25 : f32 to vector<128x256xf32>
    %48 = arith.select %46, %47, %44 : vector<128x256xi1>, vector<128x256xf32>
    %cst_26 = arith.constant dense<0xFF800000> : vector<128xf32>
    %49 = vector.multi_reduction <maximumf>, %48, %cst_26 [1] : vector<128x256xf32> to vector<128xf32>
    %50 = vector.shape_cast %49 : vector<128xf32> to vector<128x1xf32>
    %c5_i32 = arith.constant 5 : i32
    %c0_27 = arith.constant 0 : index
    %c0_28 = arith.constant 0 : index
    %51 = vector.load %arg2[%c0_27, %c0_28] : memref<128x256xf32, #tpu.memory_space<vmem>>, vector<128x256xf32>
    %52 = vector.broadcast %50 : vector<128x1xf32> to vector<128x256xf32>
    %53 = arith.cmpf oge, %51, %52 : vector<128x256xf32>
    %cst_29 = arith.constant 0xFF800000 : f32
    %54 = vector.broadcast %cst_29 : f32 to vector<128x256xf32>
    %55 = arith.select %53, %54, %51 : vector<128x256xi1>, vector<128x256xf32>
    %cst_30 = arith.constant dense<0xFF800000> : vector<128xf32>
    %56 = vector.multi_reduction <maximumf>, %55, %cst_30 [1] : vector<128x256xf32> to vector<128xf32>
    %57 = vector.shape_cast %56 : vector<128xf32> to vector<128x1xf32>
    %c6_i32 = arith.constant 6 : i32
    %c0_31 = arith.constant 0 : index
    %c0_32 = arith.constant 0 : index
    %58 = vector.load %arg2[%c0_31, %c0_32] : memref<128x256xf32, #tpu.memory_space<vmem>>, vector<128x256xf32>
    %59 = vector.broadcast %57 : vector<128x1xf32> to vector<128x256xf32>
    %60 = arith.cmpf oge, %58, %59 : vector<128x256xf32>
    %cst_33 = arith.constant 0xFF800000 : f32
    %61 = vector.broadcast %cst_33 : f32 to vector<128x256xf32>
    %62 = arith.select %60, %61, %58 : vector<128x256xi1>, vector<128x256xf32>
    %cst_34 = arith.constant dense<0xFF800000> : vector<128xf32>
    %63 = vector.multi_reduction <maximumf>, %62, %cst_34 [1] : vector<128x256xf32> to vector<128xf32>
    %64 = vector.shape_cast %63 : vector<128xf32> to vector<128x1xf32>
    %c0_35 = arith.constant 0 : index
    %c0_36 = arith.constant 0 : index
    %65 = vector.load %arg2[%c0_35, %c0_36] : memref<128x256xf32, #tpu.memory_space<vmem>>, vector<128x256xf32>
    %66 = vector.broadcast %64 : vector<128x1xf32> to vector<128x256xf32>
    %67 = arith.cmpf oge, %65, %66 : vector<128x256xf32>
    %68 = vector.broadcast %15 : vector<128x1xf32> to vector<128x256xf32>
    %69 = arith.subf %65, %68 : vector<128x256xf32>
    %70 = math.exp %69 : vector<128x256xf32>
    %cst_37 = arith.constant 0.000000e+00 : f32
    %71 = vector.broadcast %cst_37 : f32 to vector<128x256xf32>
    %72 = arith.select %67, %70, %71 : vector<128x256xi1>, vector<128x256xf32>
    %cst_38 = arith.constant dense<0.000000e+00> : vector<128xf32>
    %73 = vector.multi_reduction <add>, %72, %cst_38 [1] : vector<128x256xf32> to vector<128xf32>
    %74 = vector.shape_cast %73 : vector<128xf32> to vector<128x1xf32>
    %cst_39 = arith.constant 1.000000e+00 : f32
    %75 = vector.broadcast %cst_39 : f32 to vector<128x1xf32>
    %76 = arith.divf %75, %74 : vector<128x1xf32>
    %77 = vector.broadcast %76 : vector<128x1xf32> to vector<128x256xf32>
    %78 = arith.mulf %72, %77 : vector<128x256xf32>
    %c0_40 = arith.constant 0 : index
    %c0_41 = arith.constant 0 : index
    %79 = vector.load %arg2[%c0_40, %c0_41] : memref<128x256xf32, #tpu.memory_space<vmem>>, vector<128x256xf32>
    tpu.vector_store %arg2[%c0_40, %c0_41], %78 {strides = array<i32>} : memref<128x256xf32, #tpu.memory_space<vmem>>, vector<128x256xf32>,
    return
  }
  func.func @transform_0(%arg0: i32) -> (i32, i32) {
    %c0_i32 = arith.constant 0 : i32
    %c0_i32_0 = arith.constant 0 : i32
    %c0_i32_1 = arith.constant 0 : i32
    return %c0_i32, %c0_i32_0 : i32, i32
  }
  func.func @transform_1(%arg0: i32) -> (i32, i32) {
    %c0_i32 = arith.constant 0 : i32
    %c0_i32_0 = arith.constant 0 : i32
    return %arg0, %c0_i32 : i32, i32
  }
}

</mosaic_0001>

<bundles_post_ra>
// kernel: tpu_custom_call.1
= control target key start
LH: loop header
LB: loop body
LE: loop exit
PB: predicated region body
PF: predicated region fallthrough
CT: control target
= control target key end

     0   :  { %6 = vsyncpa [#allocation3], 0  ;;  %s3285_s0 = inlined_call_operand.hbm [shape: f32[256,128], index: 0, kind: input, shape index: {}]   ;;  %s3286_s1 = inlined_call_operand.hbm [shape: f32[256,256], index: 1, kind: output, shape index: {}]  }
   0x1   :  { %7 = vsyncpa [#allocation4], 0 }
   0x2   :  { %9 = vsyncpa [#allocation4 + $0x1], 0  ;;  %s2161_s6 = smov 0   ;;  %s2163_s7 = smov 0  }
   0x3   :  { %s2165_s8 = smov 0   ;;  %s2167_s9 = smov 0  }
   0x4 LB: > { %s2182_s10 = sadd.s32 4294967295, %s2144_s9   ;;  %s1851_s11 = sadd.s32 4294967294, %s2144_s9   ;;  %s2144_s9 = sphi %s2167_s9, %s3300_s9   ;;  %s2140_s8 = sphi %s2165_s8, %s3299_s8   ;;  %s2136_s7 = sphi %s2163_s7, %s3298_s7   ;;  %s2132_s6 = sphi %s2161_s6, %s3297_s6  }
   0x5   : > { %s2186_s12 = sadd.s32 1, %s2144_s9   ;;  %s43_s13 = sadd.s32 1, %s2140_s8 }
   0x6   : > { %s40_s14 = ssub.s32 %s2144_s9, %s2186_s12  ;;  %p53_p0 = scmp.ne.s32.totalorder %s2140_s8, %s2136_s7 }
   0x7   : > { %p41_p1 = scmp.eq.s32.totalorder %s40_s14, 0  ;;  %p54_p2 = scmp.eq.s32.totalorder %s2182_s10, 1 }
   0x8   : > { %p59_p3 = scmp.ne.s32.totalorder %s2136_s7, %s2132_s6  ;;  %p60_p4 = scmp.eq.s32.totalorder %s1851_s11, 1 }
   0x9   : > { %s2197_s15 = scalar_select %p41_p1, %s2140_s8, %s43_s13  }
   0xa   : > { %p2199_p5 = por %p54_p2, %p53_p0  ;;  %p2203_p6 = por %p60_p4, %p59_p3 }
   0xb   : > { %p1852_p7 = scmp.ge.s32.totalorder %s2144_s9, 1  ;;  %p67_p8 = scmp.lt.s32.totalorder %s2144_s9, 3 }
   0xc   : > { %p1912_p9 = scmp.eq.s32.totalorder %s2182_s10, 0  ;;  %s78_s20 = sshll.u32 %s3285_s0, 4  ;;  %s79_s20 = int_to_ptr.hbm [resolvable:$true] %s78_s20 }
   0xd   : > { %p68_p10 = pnand %p1852_p7, %p67_p8  ;;  %s2146_s21 = smov [#allocation2]  }
   0xe   : > { %s80_s22 = sshll.u32 %s2146_s21, 4  ;;  %s2147_s23 = smov 128   ;;  %s81_s22 = int_to_ptr.vmem [resolvable:$true] %s80_s22 }
   0xf   : > { %p1904_p11 = pneg %p68_p10  ;;  %s2148_s24 = smov 8  }
  0x10   : > { %96 = sbr.rel (%p68_p10) target bundleno = 1381 (0x565), region = 24 }
  0x11   : > { %p1905_p12 = pnand %p1912_p9, %p1904_p11 }
  0x13   : > { %1907 = dma.hbm_to_vmem [thread:$0]  (!%p1905_p12), %s79_s20, 4096, %s81_s22, [#allocation3], %s2147_s23, %s2147_s23, %s2148_s24  }
  0x15   : > { %2123 = dma.done.wait (%p1912_p9), [#allocation3], 4096  }
  0x16   : > { %2125 = vsyncadd (%p1912_p9), [#allocation3], 4294963200  ;;  %v145_v0 = vld [vmem:[#allocation2 + $0xf8] sm:$0xff]  ;;  %v144_v2 = vld [vmem:[#allocation2 + $0xf0] sm:$0xff]  ;;  %s1857_s25 = sshll.u32 %s2182_s10, 7  ;;  %v325_v48 = vlaneseq  ;;  %s109_s27 = sand.u32 1, %s2136_s7  }
  0x17   : > { %v129_v1 = vld [vmem:[#allocation2 + $0x78] sm:$0xff]  ;;  %228 = vmatpush.xpose.msra.mxu1 %v145_v0  ;;  %1882 = vmatpush.xpose.msra.mxu3 %v145_v0  ;;  %v128_v3 = vld [vmem:[#allocation2 + $0x70] sm:$0xff]  ;;  %v143_v4 = vld [vmem:[#allocation2 + $0xe8] sm:$0xff]  ;;  %s2220_s26 = scalar_lea.vmem [#allocation2], %s1857_s25  ;;  %s1856_s28 = sshll.u32 %s109_s27, 8 }
  0x18   : > { %163 = vmatpush.xpose.msra.mxu0 %v129_v1  ;;  %1866 = vmatpush.xpose.msra.mxu2 %v129_v1  ;;  %v127_v5 = vld [vmem:[#allocation2 + $0x68] sm:$0xff]  ;;  %v142_v6 = vld [vmem:[#allocation2 + $0xe0] sm:$0xff]  ;;  %v141_v8 = vld [vmem:[#allocation2 + $0xd8] sm:$0xff]  ;;  %v326_v49 = vand.u32 127, %v325_v48  ;;  %s3078_s29 = scalar_lea.vmem [#allocation5], %s1856_s28  ;;  %s1865_s30 = sshll.u32 %s2182_s10, 8 }
  0x19   : > { %v126_v7 = vld [vmem:[#allocation2 + $0x60] sm:$0xff]  ;;  %v125_v9 = vld [vmem:[#allocation2 + $0x58] sm:$0xff]  ;;  %v140_v10 = vld [vmem:[#allocation2 + $0xd0] sm:$0xff]  ;;  %s1783_s4 = scalar_lea.hbm %s3286_s1, %s1865_s30  ;;  %s1784_s5 = sshll.u32 %s3078_s29, 4  ;;  %s1785_s5 = int_to_ptr.vmem [resolvable:$true] %s1784_s5 }
  0x1a   : > { %v124_v11 = vld [vmem:[#allocation2 + $0x50] sm:$0xff]  ;;  %v139_v12 = vld [vmem:[#allocation2 + $0xc8] sm:$0xff]  ;;  %v138_v14 = vld [vmem:[#allocation2 + $0xc0] sm:$0xff]  ;;  %v2238_v50 = vadd.s32 128, %v326_v49  ;;  %s1786_s10 = sshll.u32 %s1783_s4, 4  ;;  %s1771_s11 = scalar_lea.sflag [#allocation4], %s109_s27  ;;  %s1787_s10 = int_to_ptr.hbm [resolvable:$true] %s1786_s10 }
  0x1b   : > { %229 = vmatpush.xpose.msra.mxu1 %v144_v2  ;;  %1883 = vmatpush.xpose.msra.mxu3 %v144_v2  ;;  %v123_v13 = vld [vmem:[#allocation2 + $0x48] sm:$0xff]  ;;  %v122_v15 = vld [vmem:[#allocation2 + $0x40] sm:$0xff]  ;;  %v137_v16 = vld [vmem:[#allocation2 + $0xb8] sm:$0xff]  ;;  %s2092_s13 = sshra.s32 %s1787_s10, 4  ;;  %s2098_s20 = scalar_lea.hbm %s3286_s1, 512  ;;  %s2093_s13 = int_to_ptr.hbm [resolvable:$true] %s2092_s13 }
  0x1c   : > { %164 = vmatpush.xpose.msra.mxu0 %v128_v3  ;;  %1867 = vmatpush.xpose.msra.mxu2 %v128_v3  ;;  %v121_v17 = vld [vmem:[#allocation2 + $0x38] sm:$0xff]  ;;  %v136_v18 = vld [vmem:[#allocation2 + $0xb0] sm:$0xff]  ;;  %v135_v20 = vld [vmem:[#allocation2 + $0xa8] sm:$0xff]  ;;  %vm329_vm0 = vcmp.lt.s32.totalorder %v2238_v50, 250  ;;  %s2094_s14 = scalar_lea.hbm %s2093_s13, 256  ;;  %p2099_p2 = scmp.lt.s32.totalorder %s2093_s13, %s3286_s1 }
  0x1d   : > { %v120_v19 = vld [vmem:[#allocation2 + $0x30] sm:$0xff]  ;;  %v119_v21 = vld [vmem:[#allocation2 + $0x28] sm:$0xff]  ;;  %v134_v22 = vld [vmem:[#allocation2 + $0xa0] sm:$0xff]  ;;  %p2095_p13 = scmp.ne.s32.totalorder %s2093_s13, %s2094_s14  ;;  %p2100_p3 = scmp.lt.s32.totalorder %s2098_s20, %s2094_s14 }
  0x1e   : > { %v118_v23 = vld [vmem:[#allocation2 + $0x20] sm:$0xff]  ;;  %v133_v24 = vld [vmem:[#allocation2 + $0x98] sm:$0xff]  ;;  %v132_v26 = vld [vmem:[#allocation2 + $0x90] sm:$0xff] }
  0x1f   : > { %230 = vmatpush.xpose.msra.mxu1 %v143_v4  ;;  %1884 = vmatpush.xpose.msra.mxu3 %v143_v4  ;;  %v117_v25 = vld [vmem:[#allocation2 + $0x18] sm:$0xff]  ;;  %v116_v27 = vld [vmem:[#allocation2 + $0x10] sm:$0xff]  ;;  %v131_v28 = vld [vmem:[#allocation2 + $0x88] sm:$0xff]  ;;  %p2096_p0 = pnand %p2095_p13, %p2199_p5  ;;  %p2101_p4 = por %p2100_p3, %p2099_p2 }
  0x20   : > { %165 = vmatpush.xpose.msra.mxu0 %v127_v5  ;;  %1868 = vmatpush.xpose.msra.mxu2 %v127_v5  ;;  %v115_v29 = vld [vmem:[#allocation2 + $0x8] sm:$0xff]  ;;  %v130_v30 = vld [vmem:[#allocation2 + $0x80] sm:$0xff]  ;;  %v149_v36 = vld [vmem:[%s2220_s26 + $0x10] sm:$0xff] }
  0x21   : > { %v114_v31 = vld [vmem:[#allocation2] sm:$0xff]  ;;  %v148_v34 = vld [vmem:[%s2220_s26 + $0x8] sm:$0xff]  ;;  %v157_v37 = vld [vmem:[%s2220_s26 + $0x50] sm:$0xff]  ;;  %p2097_p1 = pneg %p2096_p0 }
  0x22   : > { %v147_v32 = vld [vmem:[%s2220_s26] sm:$0xff]  ;;  %v156_v35 = vld [vmem:[%s2220_s26 + $0x48] sm:$0xff]  ;;  %v150_v38 = vld [vmem:[%s2220_s26 + $0x18] sm:$0xff] }
  0x23   : > { %231 = vmatpush.xpose.msra.mxu1 %v142_v6  ;;  %1885 = vmatpush.xpose.msra.mxu3 %v142_v6  ;;  %v155_v33 = vld [vmem:[%s2220_s26 + $0x40] sm:$0xff]  ;;  %v158_v39 = vld [vmem:[%s2220_s26 + $0x58] sm:$0xff]  ;;  %v152_v42 = vld [vmem:[%s2220_s26 + $0x28] sm:$0xff]  ;;  %p2102_p7 = pnand %p2101_p4, %p2097_p1 }
  0x24   : > { %166 = vmatpush.xpose.msra.mxu0 %v126_v7  ;;  %1869 = vmatpush.xpose.msra.mxu2 %v126_v7  ;;  %v151_v40 = vld [vmem:[%s2220_s26 + $0x20] sm:$0xff]  ;;  %v160_v43 = vld [vmem:[%s2220_s26 + $0x68] sm:$0xff]  ;;  %v153_v44 = vld [vmem:[%s2220_s26 + $0x30] sm:$0xff] }
  0x25   : > { %v159_v41 = vld [vmem:[%s2220_s26 + $0x60] sm:$0xff]  ;;  %v161_v45 = vld [vmem:[%s2220_s26 + $0x70] sm:$0xff]  ;;  %v154_v46 = vld [vmem:[%s2220_s26 + $0x38] sm:$0xff] }
  0x26   : > { %v162_v47 = vld [vmem:[%s2220_s26 + $0x78] sm:$0xff] }
  0x27   : > { %232 = vmatpush.xpose.msra.mxu1 %v141_v8  ;;  %1886 = vmatpush.xpose.msra.mxu3 %v141_v8 }
  0x28   : > { %167 = vmatpush.xpose.msra.mxu0 %v125_v9  ;;  %1870 = vmatpush.xpose.msra.mxu2 %v125_v9 }
  0x2b   : > { %233 = vmatpush.xpose.msra.mxu1 %v140_v10  ;;  %1887 = vmatpush.xpose.msra.mxu3 %v140_v10 }
  0x2c   : > { %168 = vmatpush.xpose.msra.mxu0 %v124_v11  ;;  %1871 = vmatpush.xpose.msra.mxu2 %v124_v11 }
  0x2f   : > { %234 = vmatpush.xpose.msra.mxu1 %v139_v12  ;;  %1888 = vmatpush.xpose.msra.mxu3 %v139_v12 }
  0x30   : > { %169 = vmatpush.xpose.msra.mxu0 %v123_v13  ;;  %1872 = vmatpush.xpose.msra.mxu2 %v123_v13 }
  0x33   : > { %235 = vmatpush.xpose.msra.mxu1 %v138_v14  ;;  %1889 = vmatpush.xpose.msra.mxu3 %v138_v14 }
  0x34   : > { %170 = vmatpush.xpose.msra.mxu0 %v122_v15  ;;  %1873 = vmatpush.xpose.msra.mxu2 %v122_v15 }
  0x37   : > { %236 = vmatpush.xpose.msra.mxu1 %v137_v16  ;;  %1890 = vmatpush.xpose.msra.mxu3 %v137_v16 }
  0x38   : > { %171 = vmatpush.xpose.msra.mxu0 %v121_v17  ;;  %1874 = vmatpush.xpose.msra.mxu2 %v121_v17 }
  0x3b   : > { %237 = vmatpush.xpose.msra.mxu1 %v136_v18  ;;  %1891 = vmatpush.xpose.msra.mxu3 %v136_v18 }
  0x3c   : > { %172 = vmatpush.xpose.msra.mxu0 %v120_v19  ;;  %1875 = vmatpush.xpose.msra.mxu2 %v120_v19 }
  0x3f   : > { %238 = vmatpush.xpose.msra.mxu1 %v135_v20  ;;  %1892 = vmatpush.xpose.msra.mxu3 %v135_v20 }
  0x40   : > { %173 = vmatpush.xpose.msra.mxu0 %v119_v21  ;;  %1876 = vmatpush.xpose.msra.mxu2 %v119_v21 }
  0x43   : > { %239 = vmatpush.xpose.msra.mxu1 %v134_v22  ;;  %1893 = vmatpush.xpose.msra.mxu3 %v134_v22 }
  0x44   : > { %174 = vmatpush.xpose.msra.mxu0 %v118_v23  ;;  %1877 = vmatpush.xpose.msra.mxu2 %v118_v23 }
  0x47   : > { %240 = vmatpush.xpose.msra.mxu1 %v133_v24  ;;  %1894 = vmatpush.xpose.msra.mxu3 %v133_v24 }
  0x48   : > { %175 = vmatpush.xpose.msra.mxu0 %v117_v25  ;;  %1878 = vmatpush.xpose.msra.mxu2 %v117_v25 }
  0x4b   : > { %241 = vmatpush.xpose.msra.mxu1 %v132_v26  ;;  %1895 = vmatpush.xpose.msra.mxu3 %v132_v26 }
  0x4c   : > { %176 = vmatpush.xpose.msra.mxu0 %v116_v27  ;;  %1879 = vmatpush.xpose.msra.mxu2 %v116_v27 }
  0x4f   : > { %242 = vmatpush.xpose.msra.mxu1 %v131_v28  ;;  %1896 = vmatpush.xpose.msra.mxu3 %v131_v28 }
  0x50   : > { %177 = vmatpush.xpose.msra.mxu0 %v115_v29  ;;  %1880 = vmatpush.xpose.msra.mxu2 %v115_v29 }
  0x53   : > { %243 = vmatpush.xpose.msra.mxu1 %v130_v30  ;;  %1897 = vmatpush.xpose.msra.mxu3 %v130_v30 }
  0x54   : > { %178 = vmatpush.xpose.msra.mxu0 %v114_v31  ;;  %1881 = vmatpush.xpose.msra.mxu2 %v114_v31 }
  0x56   : > { %244 = vmatmul.f32.vlgmr.msra.gmra.mxu1 %v147_v32  ;;  %268 = vmatmul.f32.vlgmr.msra.gmra.mxu3 %v155_v33 }
  0x57   : > { %179 = vmatmul.f32.vlgmr.msra.gmra.mxu0 %v147_v32  ;;  %203 = vmatmul.f32.vlgmr.msra.gmra.mxu2 %v155_v33 }
  0x5e   : > { %247 = vmatmul.f32.gmra.mxu1 %v148_v34  ;;  %271 = vmatmul.f32.gmra.mxu3 %v156_v35 }
  0x5f   : > { %182 = vmatmul.f32.gmra.mxu0 %v148_v34  ;;  %206 = vmatmul.f32.gmra.mxu2 %v156_v35 }
  0x66   : > { %250 = vmatmul.f32.gmra.mxu1 %v149_v36  ;;  %274 = vmatmul.f32.gmra.mxu3 %v157_v37 }
  0x67   : > { %185 = vmatmul.f32.gmra.mxu0 %v149_v36  ;;  %209 = vmatmul.f32.gmra.mxu2 %v157_v37 }
  0x6e   : > { %253 = vmatmul.f32.gmra.mxu1 %v150_v38  ;;  %277 = vmatmul.f32.gmra.mxu3 %v158_v39 }
  0x6f   : > { %188 = vmatmul.f32.gmra.mxu0 %v150_v38  ;;  %212 = vmatmul.f32.gmra.mxu2 %v158_v39 }
  0x76   : > { %256 = vmatmul.f32.gmra.mxu1 %v151_v40  ;;  %280 = vmatmul.f32.gmra.mxu3 %v159_v41 }
  0x77   : > { %191 = vmatmul.f32.gmra.mxu0 %v151_v40  ;;  %215 = vmatmul.f32.gmra.mxu2 %v159_v41 }
  0x7e   : > { %259 = vmatmul.f32.gmra.mxu1 %v152_v42  ;;  %283 = vmatmul.f32.gmra.mxu3 %v160_v43 }
  0x7f   : > { %194 = vmatmul.f32.gmra.mxu0 %v152_v42  ;;  %218 = vmatmul.f32.gmra.mxu2 %v160_v43 }
  0x86   : > { %262 = vmatmul.f32.gmra.mxu1 %v153_v44  ;;  %286 = vmatmul.f32.gmra.mxu3 %v161_v45 }
  0x87   : > { %197 = vmatmul.f32.gmra.mxu0 %v153_v44  ;;  %221 = vmatmul.f32.gmra.mxu2 %v161_v45 }
  0x8e   : > { %265 = vmatmul.f32.gmra.mxu1 %v154_v46  ;;  %289 = vmatmul.f32.gmra.mxu3 %v162_v47 }
  0x8f   : > { %200 = vmatmul.f32.gmra.mxu0 %v154_v46  ;;  %224 = vmatmul.f32.gmra.mxu2 %v162_v47 }
  0xd3   : > { %v245_v51 = vpop.f32.mrf.mxu1 }
  0xd4   : > { %v294_v52 = vmul.f32 0.5, %v245_v51  ;;  %v180_v53 = vpop.f32.mrf.mxu0 }
  0xd5   : > { %v2241_v54 = vmul.f32 0.5, %v180_v53 }
  0xd6   : > { %v2245_v55 = vsel %vm329_vm0, %v294_v52, -1e+20 }
  0xd7   : > { %v394_v56 = vmax.f32 %v2241_v54, %v2245_v55 }
  0xd9   : > { %v269_v57 = vpop.f32.mrf.mxu3  ;;  %395 = vmax.xlane.f32.xlu0 %v394_v56 }
  0xda   : > { %v310_v58 = vmul.f32 0.5, %v269_v57  ;;  %v204_v59 = vpop.f32.mrf.mxu2 }
  0xdb   : > { %v2249_v60 = vmul.f32 0.5, %v204_v59  ;;  %v248_v61 = vpop.f32.mrf.mxu1 }
  0xdc   : > { %v296_v62 = vmul.f32 0.5, %v248_v61  ;;  %v183_v63 = vpop.f32.mrf.mxu0  ;;  %v2253_v0 = vsel %vm329_vm0, %v310_v58, -1e+20 }
  0xdd   : > { %v2255_v1 = vmul.f32 0.5, %v183_v63  ;;  %v418_v2 = vmax.f32 %v2249_v60, %v2253_v0 }
  0xde   : > { %v2261_v3 = vsel %vm329_vm0, %v296_v62, -1e+20 }
  0xdf   : > { %419 = vmax.xlane.f32.xlu2 %v418_v2  ;;  %v397_v4 = vmax.f32 %v2255_v1, %v2261_v3 }
  0xe1   : > { %v272_v5 = vpop.f32.mrf.mxu3  ;;  %398 = vmax.xlane.f32.xlu0 %v397_v4 }
  0xe2   : > { %v312_v6 = vmul.f32 0.5, %v272_v5  ;;  %v207_v7 = vpop.f32.mrf.mxu2 }
  0xe3   : > { %v2265_v8 = vmul.f32 0.5, %v207_v7  ;;  %v251_v9 = vpop.f32.mrf.mxu1 }
  0xe4   : > { %v298_v10 = vmul.f32 0.5, %v251_v9  ;;  %v186_v11 = vpop.f32.mrf.mxu0  ;;  %v2269_v12 = vsel %vm329_vm0, %v312_v6, -1e+20 }
  0xe5   : > { %v2271_v13 = vmul.f32 0.5, %v186_v11  ;;  %v421_v14 = vmax.f32 %v2265_v8, %v2269_v12 }
  0xe6   : > { %v2277_v15 = vsel %vm329_vm0, %v298_v10, -1e+20 }
  0xe7   : > { %v400_v16 = vmax.f32 %v2271_v13, %v2277_v15 }
  0xe9   : > { %v275_v17 = vpop.f32.mrf.mxu3  ;;  %422 = vmax.xlane.f32.xlu0 %v421_v14  ;;  %401 = vmax.xlane.f32.xlu1 %v400_v16 }
  0xea   : > { %v314_v18 = vmul.f32 0.5, %v275_v17  ;;  %v210_v19 = vpop.f32.mrf.mxu2 }
  0xeb   : > { %v2281_v20 = vmul.f32 0.5, %v210_v19  ;;  %v254_v21 = vpop.f32.mrf.mxu1 }
  0xec   : > { %v189_v22 = vpop.f32.mrf.mxu0  ;;  %v2285_v23 = vsel %vm329_vm0, %v314_v18, -1e+20  ;;  %v300_v25 = vmul.f32 0.5, %v254_v21 }
  0xed   : > { %v424_v24 = vmax.f32 %v2281_v20, %v2285_v23  ;;  %v2289_v29 = vmul.f32 0.5, %v189_v22 }
  0xee   : > { %v2299_v34 = vsel %vm329_vm0, %v300_v25, -1e+20 }
  0xef   : > { %v403_v37 = vmax.f32 %v2289_v29, %v2299_v34 }
  0xf1   : > { %v278_v26 = vpop.f32.mrf.mxu3  ;;  %425 = vmax.xlane.f32.xlu1 %v424_v24 }
  0xf2   : > { %v316_v27 = vmul.f32 0.5, %v278_v26  ;;  %v213_v28 = vpop.f32.mrf.mxu2 }
  0xf3   : > { %v2291_v30 = vmul.f32 0.5, %v213_v28  ;;  %v257_v31 = vpop.f32.mrf.mxu1 }
  0xf4   : > { %v192_v32 = vpop.f32.mrf.mxu0  ;;  %v2295_v33 = vsel %vm329_vm0, %v316_v27, -1e+20  ;;  %v302_v36 = vmul.f32 0.5, %v257_v31 }
  0xf5   : > { %v427_v35 = vmax.f32 %v2291_v30, %v2295_v33  ;;  %v2305_v38 = vmul.f32 0.5, %v192_v32 }
  0xf6   : > { %v2309_v42 = vsel %vm329_vm0, %v302_v36, -1e+20 }
  0xf7   : > { %428 = vmax.xlane.f32.xlu2 %v427_v35  ;;  %v406_v48 = vmax.f32 %v2305_v38, %v2309_v42 }
  0xf9   : > { %v281_v39 = vpop.f32.mrf.mxu3  ;;  %404 = vmax.xlane.f32.xlu1 %v403_v37 }
  0xfa   : > { %v318_v40 = vmul.f32 0.5, %v281_v39  ;;  %v216_v41 = vpop.f32.mrf.mxu2 }
  0xfb   : > { %v2311_v43 = vmul.f32 0.5, %v216_v41  ;;  %v260_v44 = vpop.f32.mrf.mxu1 }
  0xfc   : > { %v195_v45 = vpop.f32.mrf.mxu0  ;;  %v2315_v46 = vsel %vm329_vm0, %v318_v40, -1e+20  ;;  %v304_v49 = vmul.f32 0.5, %v260_v44 }
  0xfd   : > { %v430_v47 = vmax.f32 %v2311_v43, %v2315_v46  ;;  %v2321_v51 = vmul.f32 0.5, %v195_v45 }
  0xfe   : > { %v2325_v57 = vsel %vm329_vm0, %v304_v49, -1e+20 }
  0xff   : > { %431 = vmax.xlane.f32.xlu0 %v430_v47  ;;  %407 = vmax.xlane.f32.xlu2 %v406_v48  ;;  %v409_v5 = vmax.f32 %v2321_v51, %v2325_v57 }
 0x101   : > { %v284_v52 = vpop.f32.mrf.mxu3 }
 0x102   : > { %v320_v53 = vmul.f32 0.5, %v284_v52  ;;  %v219_v56 = vpop.f32.mrf.mxu2 }
 0x103   : > { %v2327_v58 = vmul.f32 0.5, %v219_v56  ;;  %v263_v59 = vpop.f32.mrf.mxu1 }
 0x104   : > { %v306_v61 = vmul.f32 0.5, %v263_v59  ;;  %v198_v62 = vpop.f32.mrf.mxu0  ;;  %v2331_v63 = vsel %vm329_vm0, %v320_v53, -1e+20 }
 0x105   : > { %v2333_v2 = vmul.f32 0.5, %v198_v62  ;;  %v433_v4 = vmax.f32 %v2327_v58, %v2331_v63 }
 0x106   : > { %v2341_v6 = vsel %vm329_vm0, %v306_v61, -1e+20 }
 0x107   : > { %434 = vmax.xlane.f32.xlu1 %v433_v4  ;;  %410 = vmax.xlane.f32.xlu2 %v409_v5  ;;  %v412_v7 = vmax.f32 %v2333_v2, %v2341_v6 }
 0x109   : > { %v287_v9 = vpop.f32.mrf.mxu3  ;;  %413 = vmax.xlane.f32.xlu0 %v412_v7 }
 0x10a   : > { %v322_v10 = vmul.f32 0.5, %v287_v9  ;;  %v222_v11 = vpop.f32.mrf.mxu2 }
 0x10b   : > { %v2345_v14 = vmul.f32 0.5, %v222_v11  ;;  %v266_v16 = vpop.f32.mrf.mxu1 }
 0x10c   : > { %v308_v17 = vmul.f32 0.5, %v266_v16  ;;  %v201_v18 = vpop.f32.mrf.mxu0  ;;  %v2349_v19 = vsel %vm329_vm0, %v322_v10, -1e+20 }
 0x10d   : > { %v2351_v21 = vmul.f32 0.5, %v201_v18  ;;  %v436_v22 = vmax.f32 %v2345_v14, %v2349_v19 }
 0x10e   : > { %v2357_v24 = vsel %vm329_vm0, %v308_v17, -1e+20 }
 0x10f   : > { %437 = vmax.xlane.f32.xlu2 %v436_v22  ;;  %v415_v25 = vmax.f32 %v2351_v21, %v2357_v24 }
 0x111   : > { %v290_v26 = vpop.f32.mrf.mxu3  ;;  %416 = vmax.xlane.f32.xlu1 %v415_v25 }
 0x112   : > { %v324_v27 = vmul.f32 0.5, %v290_v26  ;;  %v225_v28 = vpop.f32.mrf.mxu2 }
 0x113   : > { %v2361_v31 = vmul.f32 0.5, %v225_v28 }
 0x114   : > { %v2365_v32 = vsel %vm329_vm0, %v324_v27, -1e+20 }
 0x115   : > { %v439_v35 = vmax.f32 %v2361_v31, %v2365_v32 }
 0x117   : > { %440 = vmax.xlane.f32.xlu0 %v439_v35 }
 0x14c   : > { %v2369_v36 = vpop.xlane.xlu0 %395 }
 0x14d   : > { %vm474_vm1 = vcmp.ge.f32.partialorder %v2241_v54, %v2369_v36  ;;  %vm475_vm2 = vcmp.ge.f32.partialorder %v2245_v55, %v2369_v36 }
 0x14e   : > { %v506_v37 = vsel %vm474_vm1, -inf, %v2241_v54  ;;  %v507_v39 = vsel %vm475_vm2, -inf, %v2245_v55 }
 0x14f   : > { %v538_v40 = vmax.f32 %v506_v37, %v507_v39 }
 0x151   : > { %539 = vmax.xlane.f32.xlu1 %v538_v40 }
 0x152   : > { %v2377_v50 = vpop.xlane.xlu2 %419 }
 0x153   : > { %vm490_vm3 = vcmp.ge.f32.partialorder %v2249_v60, %v2377_v50  ;;  %vm491_vm4 = vcmp.ge.f32.partialorder %v2253_v0, %v2377_v50 }
 0x154   : > { %v2383_v41 = vpop.xlane.xlu0 %398  ;;  %v522_v44 = vsel %vm490_vm3, -inf, %v2249_v60  ;;  %v523_v45 = vsel %vm491_vm4, -inf, %v2253_v0 }
 0x155   : > { %v562_v47 = vmax.f32 %v522_v44, %v523_v45  ;;  %vm476_vm5 = vcmp.ge.f32.partialorder %v2255_v1, %v2383_v41  ;;  %vm477_vm6 = vcmp.ge.f32.partialorder %v2261_v3, %v2383_v41 }
 0x156   : > { %v508_v48 = vsel %vm476_vm5, -inf, %v2255_v1  ;;  %v509_v49 = vsel %vm477_vm6, -inf, %v2261_v3 }
 0x157   : > { %563 = vmax.xlane.f32.xlu0 %v562_v47  ;;  %v541_v52 = vmax.f32 %v508_v48, %v509_v49 }
 0x159   : > { %542 = vmax.xlane.f32.xlu2 %v541_v52 }
 0x15c   : > { %v2393_v53 = vpop.xlane.xlu0 %422  ;;  %v2395_v56 = vpop.xlane.xlu1 %401 }
 0x15d   : > { %vm478_vm7 = vcmp.ge.f32.partialorder %v2271_v13, %v2395_v56  ;;  %vm479_vm8 = vcmp.ge.f32.partialorder %v2277_v15, %v2395_v56  ;;  %vm492_vm9 = vcmp.ge.f32.partialorder %v2265_v8, %v2393_v53  ;;  %vm493_vm10 = vcmp.ge.f32.partialorder %v2269_v12, %v2393_v53 }
 0x15e   : > { %v510_v59 = vsel %vm478_vm7, -inf, %v2271_v13  ;;  %v511_v61 = vsel %vm479_vm8, -inf, %v2277_v15  ;;  %v524_v62 = vsel %vm492_vm9, -inf, %v2265_v8  ;;  %v525_v5 = vsel %vm493_vm10, -inf, %v2269_v12 }
 0x15f   : > { %v544_v4 = vmax.f32 %v510_v59, %v511_v61  ;;  %v565_v7 = vmax.f32 %v524_v62, %v525_v5 }
 0x161   : > { %545 = vmax.xlane.f32.xlu0 %v544_v4  ;;  %566 = vmax.xlane.f32.xlu1 %v565_v7 }
 0x164   : > { %v2409_v9 = vpop.xlane.xlu1 %425 }
 0x165   : > { %vm494_vm11 = vcmp.ge.f32.partialorder %v2281_v20, %v2409_v9  ;;  %vm495_vm12 = vcmp.ge.f32.partialorder %v2285_v23, %v2409_v9 }
 0x166   : > { %v526_v10 = vsel %vm494_vm11, -inf, %v2281_v20  ;;  %v527_v11 = vsel %vm495_vm12, -inf, %v2285_v23 }
 0x167   : > { %v568_v16 = vmax.f32 %v526_v10, %v527_v11 }
 0x169   : > { %569 = vmax.xlane.f32.xlu2 %v568_v16 }
 0x16a   : > { %v2417_v17 = vpop.xlane.xlu2 %428 }
 0x16b   : > { %vm496_vm13 = vcmp.ge.f32.partialorder %v2291_v30, %v2417_v17  ;;  %vm497_vm14 = vcmp.ge.f32.partialorder %v2295_v33, %v2417_v17 }
 0x16c   : > { %v2423_v18 = vpop.xlane.xlu1 %404  ;;  %v528_v22 = vsel %vm496_vm13, -inf, %v2291_v30  ;;  %v529_v25 = vsel %vm497_vm14, -inf, %v2295_v33 }
 0x16d   : > { %v571_v26 = vmax.f32 %v528_v22, %v529_v25  ;;  %vm480_vm15 = vcmp.ge.f32.partialorder %v2289_v29, %v2423_v18  ;;  %vm481_vm0 = vcmp.ge.f32.partialorder %v2299_v34, %v2423_v18 }
 0x16e   : > { %v512_v27 = vsel %vm480_vm15, -inf, %v2289_v29  ;;  %v513_v28 = vsel %vm481_vm0, -inf, %v2299_v34 }
 0x16f   : > { %572 = vmax.xlane.f32.xlu0 %v571_v26  ;;  %v547_v35 = vmax.f32 %v512_v27, %v513_v28 }
 0x171   : > { %548 = vmax.xlane.f32.xlu1 %v547_v35 }
 0x172   : > { %v2433_v37 = vpop.xlane.xlu0 %431  ;;  %v2435_v39 = vpop.xlane.xlu2 %407 }
 0x173   : > { %vm482_vm1 = vcmp.ge.f32.partialorder %v2305_v38, %v2435_v39  ;;  %vm483_vm2 = vcmp.ge.f32.partialorder %v2309_v42, %v2435_v39  ;;  %vm498_vm3 = vcmp.ge.f32.partialorder %v2311_v43, %v2433_v37  ;;  %vm499_vm4 = vcmp.ge.f32.partialorder %v2315_v46, %v2433_v37 }
 0x174   : > { %v514_v40 = vsel %vm482_vm1, -inf, %v2305_v38  ;;  %v515_v44 = vsel %vm483_vm2, -inf, %v2309_v42  ;;  %v530_v45 = vsel %vm498_vm3, -inf, %v2311_v43  ;;  %v531_v48 = vsel %vm499_vm4, -inf, %v2315_v46 }
 0x175   : > { %v550_v47 = vmax.f32 %v514_v40, %v515_v44  ;;  %v574_v49 = vmax.f32 %v530_v45, %v531_v48 }
 0x177   : > { %551 = vmax.xlane.f32.xlu2 %v550_v47 }
 0x179   : > { %575 = vmax.xlane.f32.xlu1 %v574_v49 }
 0x17a   : > { %v2449_v52 = vpop.xlane.xlu1 %434  ;;  %v2451_v59 = vpop.xlane.xlu2 %410 }
 0x17b   : > { %vm500_vm5 = vcmp.ge.f32.partialorder %v2327_v58, %v2449_v52  ;;  %vm501_vm6 = vcmp.ge.f32.partialorder %v2331_v63, %v2449_v52  ;;  %vm484_vm7 = vcmp.ge.f32.partialorder %v2321_v51, %v2451_v59  ;;  %vm485_vm8 = vcmp.ge.f32.partialorder %v2325_v57, %v2451_v59 }
 0x17c   : > { %v2459_v61 = vpop.xlane.xlu0 %413  ;;  %v532_v62 = vsel %vm500_vm5, -inf, %v2327_v58  ;;  %v533_v4 = vsel %vm501_vm6, -inf, %v2331_v63  ;;  %v516_v7 = vsel %vm484_vm7, -inf, %v2321_v51  ;;  %v517_v10 = vsel %vm485_vm8, -inf, %v2325_v57 }
 0x17d   : > { %v577_v5 = vmax.f32 %v532_v62, %v533_v4  ;;  %vm486_vm9 = vcmp.ge.f32.partialorder %v2333_v2, %v2459_v61  ;;  %v553_v11 = vmax.f32 %v516_v7, %v517_v10  ;;  %vm487_vm10 = vcmp.ge.f32.partialorder %v2341_v6, %v2459_v61 }
 0x17e   : > { %v518_v16 = vsel %vm486_vm9, -inf, %v2333_v2  ;;  %v519_v22 = vsel %vm487_vm10, -inf, %v2341_v6 }
 0x17f   : > { %578 = vmax.xlane.f32.xlu2 %v577_v5  ;;  %554 = vmax.xlane.f32.xlu0 %v553_v11  ;;  %v556_v26 = vmax.f32 %v518_v16, %v519_v22 }
 0x181   : > { %557 = vmax.xlane.f32.xlu1 %v556_v26 }
 0x182   : > { %v2473_v25 = vpop.xlane.xlu2 %437 }
 0x183   : > { %vm502_vm11 = vcmp.ge.f32.partialorder %v2345_v14, %v2473_v25  ;;  %vm503_vm12 = vcmp.ge.f32.partialorder %v2349_v19, %v2473_v25 }
 0x184   : > { %v2475_v27 = vpop.xlane.xlu1 %416  ;;  %v534_v28 = vsel %vm502_vm11, -inf, %v2345_v14  ;;  %v535_v35 = vsel %vm503_vm12, -inf, %v2349_v19 }
 0x185   : > { %vm488_vm13 = vcmp.ge.f32.partialorder %v2351_v21, %v2475_v27  ;;  %vm489_vm14 = vcmp.ge.f32.partialorder %v2357_v24, %v2475_v27  ;;  %v580_v40 = vmax.f32 %v534_v28, %v535_v35 }
 0x186   : > { %v520_v44 = vsel %vm488_vm13, -inf, %v2351_v21  ;;  %v521_v45 = vsel %vm489_vm14, -inf, %v2357_v24 }
 0x187   : > { %v559_v47 = vmax.f32 %v520_v44, %v521_v45  ;;  %581 = vmax.xlane.f32.xlu0 %v580_v40 }
 0x189   : > { %560 = vmax.xlane.f32.xlu2 %v559_v47 }
 0x18a   : > { %v2489_v48 = vpop.xlane.xlu0 %440 }
 0x18b   : > { %vm504_vm15 = vcmp.ge.f32.partialorder %v2361_v31, %v2489_v48  ;;  %vm505_vm0 = vcmp.ge.f32.partialorder %v2365_v32, %v2489_v48 }
 0x18c   : > { %v536_v49 = vsel %vm504_vm15, -inf, %v2361_v31  ;;  %v537_v62 = vsel %vm505_vm0, -inf, %v2365_v32 }
 0x18d   : > { %v583_v4 = vmax.f32 %v536_v49, %v537_v62 }
 0x18f   : > { %584 = vmax.xlane.f32.xlu1 %v583_v4 }
 0x1c4   : > { %v540_v5 = vpop.xlane.xlu1 %539 }
 0x1c5   : > { %vm586_vm1 = vcmp.ge.f32.partialorder %v2241_v54, %v540_v5  ;;  %vm587_vm2 = vcmp.ge.f32.partialorder %v2245_v55, %v540_v5 }
 0x1c6   : > { %v618_v7 = vsel %vm586_vm1, -inf, %v2241_v54  ;;  %v619_v10 = vsel %vm587_vm2, -inf, %v2245_v55 }
 0x1c7   : > { %v650_v11 = vmax.f32 %v618_v7, %v619_v10 }
 0x1c9   : > { %651 = vmax.xlane.f32.xlu2 %v650_v11 }
 0x1ca   : > { %v564_v16 = vpop.xlane.xlu0 %563 }
 0x1cb   : > { %vm602_vm3 = vcmp.ge.f32.partialorder %v2249_v60, %v564_v16  ;;  %vm603_vm4 = vcmp.ge.f32.partialorder %v2253_v0, %v564_v16 }
 0x1cc   : > { %v634_v22 = vsel %vm602_vm3, -inf, %v2249_v60  ;;  %v635_v26 = vsel %vm603_vm4, -inf, %v2253_v0  ;;  %v543_v28 = vpop.xlane.xlu2 %542 }
 0x1cd   : > { %v674_v35 = vmax.f32 %v634_v22, %v635_v26  ;;  %vm588_vm5 = vcmp.ge.f32.partialorder %v2255_v1, %v543_v28  ;;  %vm589_vm6 = vcmp.ge.f32.partialorder %v2261_v3, %v543_v28 }
 0x1ce   : > { %v620_v40 = vsel %vm588_vm5, -inf, %v2255_v1  ;;  %v621_v44 = vsel %vm589_vm6, -inf, %v2261_v3 }
 0x1cf   : > { %675 = vmax.xlane.f32.xlu1 %v674_v35  ;;  %v653_v45 = vmax.f32 %v620_v40, %v621_v44 }
 0x1d1   : > { %654 = vmax.xlane.f32.xlu0 %v653_v45 }
 0x1d4   : > { %v546_v47 = vpop.xlane.xlu0 %545  ;;  %v567_v49 = vpop.xlane.xlu1 %566 }
 0x1d5   : > { %vm590_vm7 = vcmp.ge.f32.partialorder %v2271_v13, %v546_v47  ;;  %vm591_vm8 = vcmp.ge.f32.partialorder %v2277_v15, %v546_v47  ;;  %vm604_vm9 = vcmp.ge.f32.partialorder %v2265_v8, %v567_v49  ;;  %vm605_vm10 = vcmp.ge.f32.partialorder %v2269_v12, %v567_v49 }
 0x1d6   : > { %v622_v62 = vsel %vm590_vm7, -inf, %v2271_v13  ;;  %v623_v4 = vsel %vm591_vm8, -inf, %v2277_v15  ;;  %v636_v7 = vsel %vm604_vm9, -inf, %v2265_v8  ;;  %v637_v10 = vsel %vm605_vm10, -inf, %v2269_v12 }
 0x1d7   : > { %v656_v5 = vmax.f32 %v622_v62, %v623_v4  ;;  %v677_v11 = vmax.f32 %v636_v7, %v637_v10 }
 0x1d9   : > { %657 = vmax.xlane.f32.xlu1 %v656_v5  ;;  %678 = vmax.xlane.f32.xlu2 %v677_v11 }
 0x1dc   : > { %v570_v16 = vpop.xlane.xlu2 %569 }
 0x1dd   : > { %vm606_vm11 = vcmp.ge.f32.partialorder %v2281_v20, %v570_v16  ;;  %vm607_vm12 = vcmp.ge.f32.partialorder %v2285_v23, %v570_v16 }
 0x1de   : > { %v638_v22 = vsel %vm606_vm11, -inf, %v2281_v20  ;;  %v639_v26 = vsel %vm607_vm12, -inf, %v2285_v23 }
 0x1df   : > { %v680_v28 = vmax.f32 %v638_v22, %v639_v26 }
 0x1e1   : > { %681 = vmax.xlane.f32.xlu0 %v680_v28 }
 0x1e2   : > { %v573_v35 = vpop.xlane.xlu0 %572 }
 0x1e3   : > { %vm608_vm13 = vcmp.ge.f32.partialorder %v2291_v30, %v573_v35  ;;  %vm609_vm14 = vcmp.ge.f32.partialorder %v2295_v33, %v573_v35 }
 0x1e4   : > { %v640_v40 = vsel %vm608_vm13, -inf, %v2291_v30  ;;  %v641_v44 = vsel %vm609_vm14, -inf, %v2295_v33  ;;  %v549_v45 = vpop.xlane.xlu1 %548 }
 0x1e5   : > { %v683_v47 = vmax.f32 %v640_v40, %v641_v44  ;;  %vm592_vm15 = vcmp.ge.f32.partialorder %v2289_v29, %v549_v45  ;;  %vm593_vm0 = vcmp.ge.f32.partialorder %v2299_v34, %v549_v45 }
 0x1e6   : > { %v624_v49 = vsel %vm592_vm15, -inf, %v2289_v29  ;;  %v625_v62 = vsel %vm593_vm0, -inf, %v2299_v34 }
 0x1e7   : > { %684 = vmax.xlane.f32.xlu1 %v683_v47  ;;  %v659_v4 = vmax.f32 %v624_v49, %v625_v62 }
 0x1e9   : > { %660 = vmax.xlane.f32.xlu2 %v659_v4 }
 0x1ea   : > { %v552_v5 = vpop.xlane.xlu2 %551 }
 0x1eb   : > { %vm594_vm1 = vcmp.ge.f32.partialorder %v2305_v38, %v552_v5  ;;  %vm595_vm2 = vcmp.ge.f32.partialorder %v2309_v42, %v552_v5 }
 0x1ec   : > { %v576_v7 = vpop.xlane.xlu1 %575  ;;  %v626_v10 = vsel %vm594_vm1, -inf, %v2305_v38  ;;  %v627_v11 = vsel %vm595_vm2, -inf, %v2309_v42 }
 0x1ed   : > { %vm610_vm3 = vcmp.ge.f32.partialorder %v2311_v43, %v576_v7  ;;  %vm611_vm4 = vcmp.ge.f32.partialorder %v2315_v46, %v576_v7  ;;  %v662_v16 = vmax.f32 %v626_v10, %v627_v11 }
 0x1ee   : > { %v642_v22 = vsel %vm610_vm3, -inf, %v2311_v43  ;;  %v643_v26 = vsel %vm611_vm4, -inf, %v2315_v46 }
 0x1ef   : > { %663 = vmax.xlane.f32.xlu0 %v662_v16  ;;  %v686_v28 = vmax.f32 %v642_v22, %v643_v26 }
 0x1f1   : > { %687 = vmax.xlane.f32.xlu2 %v686_v28 }
 0x1f2   : > { %v579_v35 = vpop.xlane.xlu2 %578  ;;  %v555_v40 = vpop.xlane.xlu0 %554 }
 0x1f3   : > { %vm612_vm5 = vcmp.ge.f32.partialorder %v2327_v58, %v579_v35  ;;  %vm613_vm6 = vcmp.ge.f32.partialorder %v2331_v63, %v579_v35  ;;  %vm596_vm7 = vcmp.ge.f32.partialorder %v2321_v51, %v555_v40  ;;  %vm597_vm8 = vcmp.ge.f32.partialorder %v2325_v57, %v555_v40 }
 0x1f4   : > { %v644_v44 = vsel %vm612_vm5, -inf, %v2327_v58  ;;  %v645_v45 = vsel %vm613_vm6, -inf, %v2331_v63  ;;  %v558_v49 = vpop.xlane.xlu1 %557  ;;  %v628_v62 = vsel %vm596_vm7, -inf, %v2321_v51  ;;  %v629_v4 = vsel %vm597_vm8, -inf, %v2325_v57 }
 0x1f5   : > { %v689_v47 = vmax.f32 %v644_v44, %v645_v45  ;;  %vm598_vm9 = vcmp.ge.f32.partialorder %v2333_v2, %v558_v49  ;;  %vm599_vm10 = vcmp.ge.f32.partialorder %v2341_v6, %v558_v49  ;;  %v665_v5 = vmax.f32 %v628_v62, %v629_v4 }
 0x1f6   : > { %v630_v7 = vsel %vm598_vm9, -inf, %v2333_v2  ;;  %v631_v10 = vsel %vm599_vm10, -inf, %v2341_v6 }
 0x1f7   : > { %690 = vmax.xlane.f32.xlu0 %v689_v47  ;;  %666 = vmax.xlane.f32.xlu1 %v665_v5  ;;  %v668_v11 = vmax.f32 %v630_v7, %v631_v10 }
 0x1f9   : > { %669 = vmax.xlane.f32.xlu2 %v668_v11 }
 0x1fa   : > { %v582_v16 = vpop.xlane.xlu0 %581 }
 0x1fb   : > { %vm614_vm11 = vcmp.ge.f32.partialorder %v2345_v14, %v582_v16  ;;  %vm615_vm12 = vcmp.ge.f32.partialorder %v2349_v19, %v582_v16 }
 0x1fc   : > { %v561_v22 = vpop.xlane.xlu2 %560  ;;  %v646_v26 = vsel %vm614_vm11, -inf, %v2345_v14  ;;  %v647_v28 = vsel %vm615_vm12, -inf, %v2349_v19 }
 0x1fd   : > { %vm600_vm13 = vcmp.ge.f32.partialorder %v2351_v21, %v561_v22  ;;  %vm601_vm14 = vcmp.ge.f32.partialorder %v2357_v24, %v561_v22  ;;  %v692_v44 = vmax.f32 %v646_v26, %v647_v28 }
 0x1fe   : > { %v632_v35 = vsel %vm600_vm13, -inf, %v2351_v21  ;;  %v633_v40 = vsel %vm601_vm14, -inf, %v2357_v24 }
 0x1ff   : > { %v671_v45 = vmax.f32 %v632_v35, %v633_v40  ;;  %693 = vmax.xlane.f32.xlu1 %v692_v44 }
 0x201   : > { %672 = vmax.xlane.f32.xlu0 %v671_v45 }
 0x202   : > { %v585_v47 = vpop.xlane.xlu1 %584 }
 0x203   : > { %vm616_vm15 = vcmp.ge.f32.partialorder %v2361_v31, %v585_v47  ;;  %vm617_vm0 = vcmp.ge.f32.partialorder %v2365_v32, %v585_v47 }
 0x204   : > { %v648_v49 = vsel %vm616_vm15, -inf, %v2361_v31  ;;  %v649_v62 = vsel %vm617_vm0, -inf, %v2365_v32 }
 0x205   : > { %v695_v4 = vmax.f32 %v648_v49, %v649_v62 }
 0x207   : > { %696 = vmax.xlane.f32.xlu2 %v695_v4 }
 0x23c   : > { %v652_v5 = vpop.xlane.xlu2 %651 }
 0x23d   : > { %vm698_vm1 = vcmp.ge.f32.partialorder %v2241_v54, %v652_v5  ;;  %vm699_vm2 = vcmp.ge.f32.partialorder %v2245_v55, %v652_v5 }
 0x23e   : > { %v730_v7 = vsel %vm698_vm1, -inf, %v2241_v54  ;;  %v731_v10 = vsel %vm699_vm2, -inf, %v2245_v55 }
 0x23f   : > { %v762_v11 = vmax.f32 %v730_v7, %v731_v10 }
 0x241   : > { %763 = vmax.xlane.f32.xlu0 %v762_v11 }
 0x242   : > { %v676_v16 = vpop.xlane.xlu1 %675 }
 0x243   : > { %vm714_vm3 = vcmp.ge.f32.partialorder %v2249_v60, %v676_v16  ;;  %vm715_vm4 = vcmp.ge.f32.partialorder %v2253_v0, %v676_v16 }
 0x244   : > { %v746_v22 = vsel %vm714_vm3, -inf, %v2249_v60  ;;  %v747_v26 = vsel %vm715_vm4, -inf, %v2253_v0  ;;  %v655_v28 = vpop.xlane.xlu0 %654 }
 0x245   : > { %v786_v35 = vmax.f32 %v746_v22, %v747_v26  ;;  %vm700_vm5 = vcmp.ge.f32.partialorder %v2255_v1, %v655_v28  ;;  %vm701_vm6 = vcmp.ge.f32.partialorder %v2261_v3, %v655_v28 }
 0x246   : > { %v732_v40 = vsel %vm700_vm5, -inf, %v2255_v1  ;;  %v733_v44 = vsel %vm701_vm6, -inf, %v2261_v3 }
 0x247   : > { %787 = vmax.xlane.f32.xlu2 %v786_v35  ;;  %v765_v45 = vmax.f32 %v732_v40, %v733_v44 }
 0x249   : > { %766 = vmax.xlane.f32.xlu1 %v765_v45 }
 0x24c   : > { %v658_v47 = vpop.xlane.xlu1 %657  ;;  %v679_v49 = vpop.xlane.xlu2 %678 }
 0x24d   : > { %vm702_vm7 = vcmp.ge.f32.partialorder %v2271_v13, %v658_v47  ;;  %vm703_vm8 = vcmp.ge.f32.partialorder %v2277_v15, %v658_v47  ;;  %vm716_vm9 = vcmp.ge.f32.partialorder %v2265_v8, %v679_v49  ;;  %vm717_vm10 = vcmp.ge.f32.partialorder %v2269_v12, %v679_v49 }
 0x24e   : > { %v734_v62 = vsel %vm702_vm7, -inf, %v2271_v13  ;;  %v735_v4 = vsel %vm703_vm8, -inf, %v2277_v15  ;;  %v748_v7 = vsel %vm716_vm9, -inf, %v2265_v8  ;;  %v749_v10 = vsel %vm717_vm10, -inf, %v2269_v12 }
 0x24f   : > { %v768_v5 = vmax.f32 %v734_v62, %v735_v4  ;;  %v789_v11 = vmax.f32 %v748_v7, %v749_v10 }
 0x251   : > { %769 = vmax.xlane.f32.xlu2 %v768_v5  ;;  %790 = vmax.xlane.f32.xlu0 %v789_v11 }
 0x254   : > { %v682_v16 = vpop.xlane.xlu0 %681 }
 0x255   : > { %vm718_vm11 = vcmp.ge.f32.partialorder %v2281_v20, %v682_v16  ;;  %vm719_vm12 = vcmp.ge.f32.partialorder %v2285_v23, %v682_v16 }
 0x256   : > { %v750_v22 = vsel %vm718_vm11, -inf, %v2281_v20  ;;  %v751_v26 = vsel %vm719_vm12, -inf, %v2285_v23 }
 0x257   : > { %v792_v28 = vmax.f32 %v750_v22, %v751_v26 }
 0x259   : > { %793 = vmax.xlane.f32.xlu1 %v792_v28 }
 0x25a   : > { %v685_v35 = vpop.xlane.xlu1 %684 }
 0x25b   : > { %vm720_vm13 = vcmp.ge.f32.partialorder %v2291_v30, %v685_v35  ;;  %vm721_vm14 = vcmp.ge.f32.partialorder %v2295_v33, %v685_v35 }
 0x25c   : > { %v752_v40 = vsel %vm720_vm13, -inf, %v2291_v30  ;;  %v753_v44 = vsel %vm721_vm14, -inf, %v2295_v33  ;;  %v661_v45 = vpop.xlane.xlu2 %660 }
 0x25d   : > { %v795_v47 = vmax.f32 %v752_v40, %v753_v44  ;;  %vm704_vm15 = vcmp.ge.f32.partialorder %v2289_v29, %v661_v45  ;;  %vm705_vm0 = vcmp.ge.f32.partialorder %v2299_v34, %v661_v45 }
 0x25e   : > { %v736_v49 = vsel %vm704_vm15, -inf, %v2289_v29  ;;  %v737_v62 = vsel %vm705_vm0, -inf, %v2299_v34 }
 0x25f   : > { %796 = vmax.xlane.f32.xlu2 %v795_v47  ;;  %v771_v4 = vmax.f32 %v736_v49, %v737_v62 }
 0x261   : > { %772 = vmax.xlane.f32.xlu0 %v771_v4 }
 0x262   : > { %v664_v5 = vpop.xlane.xlu0 %663 }
 0x263   : > { %vm706_vm1 = vcmp.ge.f32.partialorder %v2305_v38, %v664_v5  ;;  %vm707_vm2 = vcmp.ge.f32.partialorder %v2309_v42, %v664_v5 }
 0x264   : > { %v688_v7 = vpop.xlane.xlu2 %687  ;;  %v738_v10 = vsel %vm706_vm1, -inf, %v2305_v38  ;;  %v739_v11 = vsel %vm707_vm2, -inf, %v2309_v42 }
 0x265   : > { %vm722_vm3 = vcmp.ge.f32.partialorder %v2311_v43, %v688_v7  ;;  %vm723_vm4 = vcmp.ge.f32.partialorder %v2315_v46, %v688_v7  ;;  %v774_v16 = vmax.f32 %v738_v10, %v739_v11 }
 0x266   : > { %v754_v22 = vsel %vm722_vm3, -inf, %v2311_v43  ;;  %v755_v26 = vsel %vm723_vm4, -inf, %v2315_v46 }
 0x267   : > { %775 = vmax.xlane.f32.xlu1 %v774_v16  ;;  %v798_v28 = vmax.f32 %v754_v22, %v755_v26 }
 0x269   : > { %799 = vmax.xlane.f32.xlu0 %v798_v28 }
 0x26a   : > { %v691_v35 = vpop.xlane.xlu0 %690  ;;  %v667_v40 = vpop.xlane.xlu1 %666 }
 0x26b   : > { %vm724_vm5 = vcmp.ge.f32.partialorder %v2327_v58, %v691_v35  ;;  %vm725_vm6 = vcmp.ge.f32.partialorder %v2331_v63, %v691_v35  ;;  %vm708_vm7 = vcmp.ge.f32.partialorder %v2321_v51, %v667_v40  ;;  %vm709_vm8 = vcmp.ge.f32.partialorder %v2325_v57, %v667_v40 }
 0x26c   : > { %v756_v44 = vsel %vm724_vm5, -inf, %v2327_v58  ;;  %v757_v45 = vsel %vm725_vm6, -inf, %v2331_v63  ;;  %v670_v49 = vpop.xlane.xlu2 %669  ;;  %v740_v62 = vsel %vm708_vm7, -inf, %v2321_v51  ;;  %v741_v4 = vsel %vm709_vm8, -inf, %v2325_v57 }
 0x26d   : > { %v801_v47 = vmax.f32 %v756_v44, %v757_v45  ;;  %vm710_vm9 = vcmp.ge.f32.partialorder %v2333_v2, %v670_v49  ;;  %vm711_vm10 = vcmp.ge.f32.partialorder %v2341_v6, %v670_v49  ;;  %v777_v5 = vmax.f32 %v740_v62, %v741_v4 }
 0x26e   : > { %v742_v7 = vsel %vm710_vm9, -inf, %v2333_v2  ;;  %v743_v10 = vsel %vm711_vm10, -inf, %v2341_v6 }
 0x26f   : > { %802 = vmax.xlane.f32.xlu1 %v801_v47  ;;  %778 = vmax.xlane.f32.xlu2 %v777_v5  ;;  %v780_v11 = vmax.f32 %v742_v7, %v743_v10 }
 0x271   : > { %781 = vmax.xlane.f32.xlu0 %v780_v11 }
 0x272   : > { %v694_v16 = vpop.xlane.xlu1 %693 }
 0x273   : > { %vm726_vm11 = vcmp.ge.f32.partialorder %v2345_v14, %v694_v16  ;;  %vm727_vm12 = vcmp.ge.f32.partialorder %v2349_v19, %v694_v16 }
 0x274   : > { %v673_v22 = vpop.xlane.xlu0 %672  ;;  %v758_v26 = vsel %vm726_vm11, -inf, %v2345_v14  ;;  %v759_v28 = vsel %vm727_vm12, -inf, %v2349_v19 }
 0x275   : > { %vm712_vm13 = vcmp.ge.f32.partialorder %v2351_v21, %v673_v22  ;;  %vm713_vm14 = vcmp.ge.f32.partialorder %v2357_v24, %v673_v22  ;;  %v804_v44 = vmax.f32 %v758_v26, %v759_v28 }
 0x276   : > { %v744_v35 = vsel %vm712_vm13, -inf, %v2351_v21  ;;  %v745_v40 = vsel %vm713_vm14, -inf, %v2357_v24 }
 0x277   : > { %v783_v45 = vmax.f32 %v744_v35, %v745_v40  ;;  %805 = vmax.xlane.f32.xlu2 %v804_v44 }
 0x279   : > { %784 = vmax.xlane.f32.xlu1 %v783_v45 }
 0x27a   : > { %v697_v47 = vpop.xlane.xlu2 %696 }
 0x27b   : > { %vm728_vm15 = vcmp.ge.f32.partialorder %v2361_v31, %v697_v47  ;;  %vm729_vm0 = vcmp.ge.f32.partialorder %v2365_v32, %v697_v47 }
 0x27c   : > { %v760_v49 = vsel %vm728_vm15, -inf, %v2361_v31  ;;  %v761_v62 = vsel %vm729_vm0, -inf, %v2365_v32 }
 0x27d   : > { %v807_v4 = vmax.f32 %v760_v49, %v761_v62 }
 0x27f   : > { %808 = vmax.xlane.f32.xlu0 %v807_v4 }
 0x2b4   : > { %v764_v5 = vpop.xlane.xlu0 %763 }
 0x2b5   : > { %vm810_vm1 = vcmp.ge.f32.partialorder %v2241_v54, %v764_v5  ;;  %vm811_vm2 = vcmp.ge.f32.partialorder %v2245_v55, %v764_v5 }
 0x2b6   : > { %v842_v7 = vsel %vm810_vm1, -inf, %v2241_v54  ;;  %v843_v10 = vsel %vm811_vm2, -inf, %v2245_v55 }
 0x2b7   : > { %v874_v11 = vmax.f32 %v842_v7, %v843_v10 }
 0x2b9   : > { %875 = vmax.xlane.f32.xlu1 %v874_v11 }
 0x2ba   : > { %v788_v16 = vpop.xlane.xlu2 %787 }
 0x2bb   : > { %vm826_vm3 = vcmp.ge.f32.partialorder %v2249_v60, %v788_v16  ;;  %vm827_vm4 = vcmp.ge.f32.partialorder %v2253_v0, %v788_v16 }
 0x2bc   : > { %v858_v22 = vsel %vm826_vm3, -inf, %v2249_v60  ;;  %v859_v26 = vsel %vm827_vm4, -inf, %v2253_v0  ;;  %v767_v28 = vpop.xlane.xlu1 %766 }
 0x2bd   : > { %v898_v35 = vmax.f32 %v858_v22, %v859_v26  ;;  %vm812_vm5 = vcmp.ge.f32.partialorder %v2255_v1, %v767_v28  ;;  %vm813_vm6 = vcmp.ge.f32.partialorder %v2261_v3, %v767_v28 }
 0x2be   : > { %v844_v40 = vsel %vm812_vm5, -inf, %v2255_v1  ;;  %v845_v44 = vsel %vm813_vm6, -inf, %v2261_v3 }
 0x2bf   : > { %899 = vmax.xlane.f32.xlu0 %v898_v35  ;;  %v877_v45 = vmax.f32 %v844_v40, %v845_v44 }
 0x2c1   : > { %878 = vmax.xlane.f32.xlu2 %v877_v45 }
 0x2c4   : > { %v770_v47 = vpop.xlane.xlu2 %769  ;;  %v791_v49 = vpop.xlane.xlu0 %790 }
 0x2c5   : > { %vm814_vm7 = vcmp.ge.f32.partialorder %v2271_v13, %v770_v47  ;;  %vm815_vm8 = vcmp.ge.f32.partialorder %v2277_v15, %v770_v47  ;;  %vm828_vm9 = vcmp.ge.f32.partialorder %v2265_v8, %v791_v49  ;;  %vm829_vm10 = vcmp.ge.f32.partialorder %v2269_v12, %v791_v49 }
 0x2c6   : > { %v846_v62 = vsel %vm814_vm7, -inf, %v2271_v13  ;;  %v847_v4 = vsel %vm815_vm8, -inf, %v2277_v15  ;;  %v860_v5 = vsel %vm828_vm9, -inf, %v2265_v8  ;;  %v861_v7 = vsel %vm829_vm10, -inf, %v2269_v12 }
 0x2c7   : > { %v880_v10 = vmax.f32 %v846_v62, %v847_v4  ;;  %v901_v11 = vmax.f32 %v860_v5, %v861_v7 }
 0x2c9   : > { %881 = vmax.xlane.f32.xlu0 %v880_v10  ;;  %902 = vmax.xlane.f32.xlu1 %v901_v11 }
 0x2cc   : > { %v794_v16 = vpop.xlane.xlu1 %793 }
 0x2cd   : > { %vm830_vm11 = vcmp.ge.f32.partialorder %v2281_v20, %v794_v16  ;;  %vm831_vm12 = vcmp.ge.f32.partialorder %v2285_v23, %v794_v16 }
 0x2ce   : > { %v862_v22 = vsel %vm830_vm11, -inf, %v2281_v20  ;;  %v863_v26 = vsel %vm831_vm12, -inf, %v2285_v23 }
 0x2cf   : > { %v904_v28 = vmax.f32 %v862_v22, %v863_v26 }
 0x2d1   : > { %905 = vmax.xlane.f32.xlu2 %v904_v28 }
 0x2d2   : > { %v797_v35 = vpop.xlane.xlu2 %796 }
 0x2d3   : > { %vm832_vm13 = vcmp.ge.f32.partialorder %v2291_v30, %v797_v35  ;;  %vm833_vm14 = vcmp.ge.f32.partialorder %v2295_v33, %v797_v35 }
 0x2d4   : > { %v864_v40 = vsel %vm832_vm13, -inf, %v2291_v30  ;;  %v865_v44 = vsel %vm833_vm14, -inf, %v2295_v33  ;;  %v773_v45 = vpop.xlane.xlu0 %772 }
 0x2d5   : > { %v907_v47 = vmax.f32 %v864_v40, %v865_v44  ;;  %vm816_vm15 = vcmp.ge.f32.partialorder %v2289_v29, %v773_v45  ;;  %vm817_vm0 = vcmp.ge.f32.partialorder %v2299_v34, %v773_v45 }
 0x2d6   : > { %v848_v49 = vsel %vm816_vm15, -inf, %v2289_v29  ;;  %v849_v62 = vsel %vm817_vm0, -inf, %v2299_v34 }
 0x2d7   : > { %908 = vmax.xlane.f32.xlu0 %v907_v47  ;;  %v883_v4 = vmax.f32 %v848_v49, %v849_v62 }
 0x2d9   : > { %884 = vmax.xlane.f32.xlu1 %v883_v4 }
 0x2da   : > { %v776_v5 = vpop.xlane.xlu1 %775 }
 0x2db   : > { %vm818_vm1 = vcmp.ge.f32.partialorder %v2305_v38, %v776_v5  ;;  %vm819_vm2 = vcmp.ge.f32.partialorder %v2309_v42, %v776_v5 }
 0x2dc   : > { %v800_v7 = vpop.xlane.xlu0 %799  ;;  %v850_v10 = vsel %vm818_vm1, -inf, %v2305_v38  ;;  %v851_v11 = vsel %vm819_vm2, -inf, %v2309_v42 }
 0x2dd   : > { %vm834_vm3 = vcmp.ge.f32.partialorder %v2311_v43, %v800_v7  ;;  %vm835_vm4 = vcmp.ge.f32.partialorder %v2315_v46, %v800_v7  ;;  %v886_v16 = vmax.f32 %v850_v10, %v851_v11 }
 0x2de   : > { %v866_v22 = vsel %vm834_vm3, -inf, %v2311_v43  ;;  %v867_v26 = vsel %vm835_vm4, -inf, %v2315_v46 }
 0x2df   : > { %887 = vmax.xlane.f32.xlu2 %v886_v16  ;;  %v910_v28 = vmax.f32 %v866_v22, %v867_v26 }
 0x2e1   : > { %911 = vmax.xlane.f32.xlu1 %v910_v28 }
 0x2e2   : > { %v803_v35 = vpop.xlane.xlu1 %802  ;;  %v779_v40 = vpop.xlane.xlu2 %778 }
 0x2e3   : > { %vm836_vm5 = vcmp.ge.f32.partialorder %v2327_v58, %v803_v35  ;;  %vm837_vm6 = vcmp.ge.f32.partialorder %v2331_v63, %v803_v35  ;;  %vm820_vm7 = vcmp.ge.f32.partialorder %v2321_v51, %v779_v40  ;;  %vm821_vm8 = vcmp.ge.f32.partialorder %v2325_v57, %v779_v40 }
 0x2e4   : > { %v868_v44 = vsel %vm836_vm5, -inf, %v2327_v58  ;;  %v869_v45 = vsel %vm837_vm6, -inf, %v2331_v63  ;;  %v782_v49 = vpop.xlane.xlu0 %781  ;;  %v852_v62 = vsel %vm820_vm7, -inf, %v2321_v51  ;;  %v853_v4 = vsel %vm821_vm8, -inf, %v2325_v57 }
 0x2e5   : > { %v913_v47 = vmax.f32 %v868_v44, %v869_v45  ;;  %vm822_vm9 = vcmp.ge.f32.partialorder %v2333_v2, %v782_v49  ;;  %vm823_vm10 = vcmp.ge.f32.partialorder %v2341_v6, %v782_v49  ;;  %v889_v5 = vmax.f32 %v852_v62, %v853_v4 }
 0x2e6   : > { %v854_v7 = vsel %vm822_vm9, -inf, %v2333_v2  ;;  %v855_v10 = vsel %vm823_vm10, -inf, %v2341_v6 }
 0x2e7   : > { %914 = vmax.xlane.f32.xlu2 %v913_v47  ;;  %890 = vmax.xlane.f32.xlu0 %v889_v5  ;;  %v892_v11 = vmax.f32 %v854_v7, %v855_v10 }
 0x2e9   : > { %893 = vmax.xlane.f32.xlu1 %v892_v11 }
 0x2ea   : > { %v806_v16 = vpop.xlane.xlu2 %805 }
 0x2eb   : > { %vm838_vm11 = vcmp.ge.f32.partialorder %v2345_v14, %v806_v16  ;;  %vm839_vm12 = vcmp.ge.f32.partialorder %v2349_v19, %v806_v16 }
 0x2ec   : > { %v785_v22 = vpop.xlane.xlu1 %784  ;;  %v870_v26 = vsel %vm838_vm11, -inf, %v2345_v14  ;;  %v871_v28 = vsel %vm839_vm12, -inf, %v2349_v19 }
 0x2ed   : > { %vm824_vm13 = vcmp.ge.f32.partialorder %v2351_v21, %v785_v22  ;;  %vm825_vm14 = vcmp.ge.f32.partialorder %v2357_v24, %v785_v22  ;;  %v916_v44 = vmax.f32 %v870_v26, %v871_v28 }
 0x2ee   : > { %v856_v35 = vsel %vm824_vm13, -inf, %v2351_v21  ;;  %v857_v40 = vsel %vm825_vm14, -inf, %v2357_v24 }
 0x2ef   : > { %v895_v45 = vmax.f32 %v856_v35, %v857_v40  ;;  %917 = vmax.xlane.f32.xlu0 %v916_v44 }
 0x2f1   : > { %896 = vmax.xlane.f32.xlu2 %v895_v45 }
 0x2f2   : > { %v809_v47 = vpop.xlane.xlu0 %808 }
 0x2f3   : > { %vm840_vm15 = vcmp.ge.f32.partialorder %v2361_v31, %v809_v47  ;;  %vm841_vm0 = vcmp.ge.f32.partialorder %v2365_v32, %v809_v47 }
 0x2f4   : > { %v872_v49 = vsel %vm840_vm15, -inf, %v2361_v31  ;;  %v873_v62 = vsel %vm841_vm0, -inf, %v2365_v32 }
 0x2f5   : > { %v919_v4 = vmax.f32 %v872_v49, %v873_v62 }
 0x2f7   : > { %920 = vmax.xlane.f32.xlu1 %v919_v4 }
 0x32c   : > { %v876_v5 = vpop.xlane.xlu1 %875 }
 0x32d   : > { %vm922_vm1 = vcmp.ge.f32.partialorder %v2241_v54, %v876_v5  ;;  %vm923_vm2 = vcmp.ge.f32.partialorder %v2245_v55, %v876_v5 }
 0x32e   : > { %v954_v7 = vsel %vm922_vm1, -inf, %v2241_v54  ;;  %v955_v10 = vsel %vm923_vm2, -inf, %v2245_v55 }
 0x32f   : > { %v986_v11 = vmax.f32 %v954_v7, %v955_v10 }
 0x331   : > { %987 = vmax.xlane.f32.xlu2 %v986_v11 }
 0x332   : > { %v900_v16 = vpop.xlane.xlu0 %899 }
 0x333   : > { %vm938_vm3 = vcmp.ge.f32.partialorder %v2249_v60, %v900_v16  ;;  %vm939_vm4 = vcmp.ge.f32.partialorder %v2253_v0, %v900_v16 }
 0x334   : > { %v970_v22 = vsel %vm938_vm3, -inf, %v2249_v60  ;;  %v971_v26 = vsel %vm939_vm4, -inf, %v2253_v0  ;;  %v879_v28 = vpop.xlane.xlu2 %878 }
 0x335   : > { %v1010_v35 = vmax.f32 %v970_v22, %v971_v26  ;;  %vm924_vm5 = vcmp.ge.f32.partialorder %v2255_v1, %v879_v28  ;;  %vm925_vm6 = vcmp.ge.f32.partialorder %v2261_v3, %v879_v28 }
 0x336   : > { %v956_v40 = vsel %vm924_vm5, -inf, %v2255_v1  ;;  %v957_v44 = vsel %vm925_vm6, -inf, %v2261_v3 }
 0x337   : > { %1011 = vmax.xlane.f32.xlu1 %v1010_v35  ;;  %v989_v45 = vmax.f32 %v956_v40, %v957_v44 }
 0x339   : > { %990 = vmax.xlane.f32.xlu0 %v989_v45 }
 0x33c   : > { %v882_v47 = vpop.xlane.xlu0 %881  ;;  %v903_v49 = vpop.xlane.xlu1 %902 }
 0x33d   : > { %vm926_vm7 = vcmp.ge.f32.partialorder %v2271_v13, %v882_v47  ;;  %vm927_vm8 = vcmp.ge.f32.partialorder %v2277_v15, %v882_v47  ;;  %vm940_vm9 = vcmp.ge.f32.partialorder %v2265_v8, %v903_v49  ;;  %vm941_vm10 = vcmp.ge.f32.partialorder %v2269_v12, %v903_v49 }
 0x33e   : > { %v958_v62 = vsel %vm926_vm7, -inf, %v2271_v13  ;;  %v959_v4 = vsel %vm927_vm8, -inf, %v2277_v15  ;;  %v972_v5 = vsel %vm940_vm9, -inf, %v2265_v8  ;;  %v973_v7 = vsel %vm941_vm10, -inf, %v2269_v12 }
 0x33f   : > { %v992_v10 = vmax.f32 %v958_v62, %v959_v4  ;;  %v1013_v11 = vmax.f32 %v972_v5, %v973_v7 }
 0x341   : > { %993 = vmax.xlane.f32.xlu1 %v992_v10  ;;  %1014 = vmax.xlane.f32.xlu2 %v1013_v11 }
 0x344   : > { %v906_v16 = vpop.xlane.xlu2 %905 }
 0x345   : > { %vm942_vm11 = vcmp.ge.f32.partialorder %v2281_v20, %v906_v16  ;;  %vm943_vm12 = vcmp.ge.f32.partialorder %v2285_v23, %v906_v16 }
 0x346   : > { %v974_v22 = vsel %vm942_vm11, -inf, %v2281_v20  ;;  %v975_v26 = vsel %vm943_vm12, -inf, %v2285_v23 }
 0x347   : > { %v1016_v28 = vmax.f32 %v974_v22, %v975_v26 }
 0x349   : > { %1017 = vmax.xlane.f32.xlu0 %v1016_v28 }
 0x34a   : > { %v909_v35 = vpop.xlane.xlu0 %908 }
 0x34b   : > { %vm944_vm13 = vcmp.ge.f32.partialorder %v2291_v30, %v909_v35  ;;  %vm945_vm14 = vcmp.ge.f32.partialorder %v2295_v33, %v909_v35 }
 0x34c   : > { %v976_v40 = vsel %vm944_vm13, -inf, %v2291_v30  ;;  %v977_v44 = vsel %vm945_vm14, -inf, %v2295_v33  ;;  %v885_v45 = vpop.xlane.xlu1 %884 }
 0x34d   : > { %v1019_v47 = vmax.f32 %v976_v40, %v977_v44  ;;  %vm928_vm15 = vcmp.ge.f32.partialorder %v2289_v29, %v885_v45  ;;  %vm929_vm0 = vcmp.ge.f32.partialorder %v2299_v34, %v885_v45 }
 0x34e   : > { %v960_v49 = vsel %vm928_vm15, -inf, %v2289_v29  ;;  %v961_v62 = vsel %vm929_vm0, -inf, %v2299_v34 }
 0x34f   : > { %1020 = vmax.xlane.f32.xlu1 %v1019_v47  ;;  %v995_v4 = vmax.f32 %v960_v49, %v961_v62 }
 0x351   : > { %996 = vmax.xlane.f32.xlu2 %v995_v4 }
 0x352   : > { %v888_v5 = vpop.xlane.xlu2 %887 }
 0x353   : > { %vm930_vm1 = vcmp.ge.f32.partialorder %v2305_v38, %v888_v5  ;;  %vm931_vm2 = vcmp.ge.f32.partialorder %v2309_v42, %v888_v5 }
 0x354   : > { %v912_v7 = vpop.xlane.xlu1 %911  ;;  %v962_v10 = vsel %vm930_vm1, -inf, %v2305_v38  ;;  %v963_v11 = vsel %vm931_vm2, -inf, %v2309_v42 }
 0x355   : > { %vm946_vm3 = vcmp.ge.f32.partialorder %v2311_v43, %v912_v7  ;;  %vm947_vm4 = vcmp.ge.f32.partialorder %v2315_v46, %v912_v7  ;;  %v998_v16 = vmax.f32 %v962_v10, %v963_v11 }
 0x356   : > { %v978_v22 = vsel %vm946_vm3, -inf, %v2311_v43  ;;  %v979_v26 = vsel %vm947_vm4, -inf, %v2315_v46 }
 0x357   : > { %999 = vmax.xlane.f32.xlu0 %v998_v16  ;;  %v1022_v28 = vmax.f32 %v978_v22, %v979_v26 }
 0x359   : > { %1023 = vmax.xlane.f32.xlu2 %v1022_v28 }
 0x35a   : > { %v915_v35 = vpop.xlane.xlu2 %914  ;;  %v891_v40 = vpop.xlane.xlu0 %890 }
 0x35b   : > { %vm948_vm5 = vcmp.ge.f32.partialorder %v2327_v58, %v915_v35  ;;  %vm949_vm6 = vcmp.ge.f32.partialorder %v2331_v63, %v915_v35  ;;  %vm932_vm7 = vcmp.ge.f32.partialorder %v2321_v51, %v891_v40  ;;  %vm933_vm8 = vcmp.ge.f32.partialorder %v2325_v57, %v891_v40 }
 0x35c   : > { %v980_v44 = vsel %vm948_vm5, -inf, %v2327_v58  ;;  %v981_v45 = vsel %vm949_vm6, -inf, %v2331_v63  ;;  %v894_v49 = vpop.xlane.xlu1 %893  ;;  %v964_v62 = vsel %vm932_vm7, -inf, %v2321_v51  ;;  %v965_v4 = vsel %vm933_vm8, -inf, %v2325_v57 }
 0x35d   : > { %v1025_v47 = vmax.f32 %v980_v44, %v981_v45  ;;  %vm934_vm9 = vcmp.ge.f32.partialorder %v2333_v2, %v894_v49  ;;  %vm935_vm10 = vcmp.ge.f32.partialorder %v2341_v6, %v894_v49  ;;  %v1001_v5 = vmax.f32 %v964_v62, %v965_v4 }
 0x35e   : > { %v966_v7 = vsel %vm934_vm9, -inf, %v2333_v2  ;;  %v967_v10 = vsel %vm935_vm10, -inf, %v2341_v6 }
 0x35f   : > { %1026 = vmax.xlane.f32.xlu0 %v1025_v47  ;;  %1002 = vmax.xlane.f32.xlu1 %v1001_v5  ;;  %v1004_v11 = vmax.f32 %v966_v7, %v967_v10 }
 0x361   : > { %1005 = vmax.xlane.f32.xlu2 %v1004_v11 }
 0x362   : > { %v918_v16 = vpop.xlane.xlu0 %917 }
 0x363   : > { %vm950_vm11 = vcmp.ge.f32.partialorder %v2345_v14, %v918_v16  ;;  %vm951_vm12 = vcmp.ge.f32.partialorder %v2349_v19, %v918_v16 }
 0x364   : > { %v897_v22 = vpop.xlane.xlu2 %896  ;;  %v982_v26 = vsel %vm950_vm11, -inf, %v2345_v14  ;;  %v983_v28 = vsel %vm951_vm12, -inf, %v2349_v19 }
 0x365   : > { %vm936_vm13 = vcmp.ge.f32.partialorder %v2351_v21, %v897_v22  ;;  %vm937_vm14 = vcmp.ge.f32.partialorder %v2357_v24, %v897_v22  ;;  %v1028_v44 = vmax.f32 %v982_v26, %v983_v28 }
 0x366   : > { %v968_v35 = vsel %vm936_vm13, -inf, %v2351_v21  ;;  %v969_v40 = vsel %vm937_vm14, -inf, %v2357_v24 }
 0x367   : > { %v1007_v45 = vmax.f32 %v968_v35, %v969_v40  ;;  %1029 = vmax.xlane.f32.xlu1 %v1028_v44 }
 0x369   : > { %1008 = vmax.xlane.f32.xlu0 %v1007_v45 }
 0x36a   : > { %v921_v47 = vpop.xlane.xlu1 %920 }
 0x36b   : > { %vm952_vm15 = vcmp.ge.f32.partialorder %v2361_v31, %v921_v47  ;;  %vm953_vm0 = vcmp.ge.f32.partialorder %v2365_v32, %v921_v47 }
 0x36c   : > { %v984_v49 = vsel %vm952_vm15, -inf, %v2361_v31  ;;  %v985_v62 = vsel %vm953_vm0, -inf, %v2365_v32 }
 0x36d   : > { %v1031_v4 = vmax.f32 %v984_v49, %v985_v62 }
 0x36f   : > { %1032 = vmax.xlane.f32.xlu2 %v1031_v4 }
 0x3a4   : > { %v988_v5 = vpop.xlane.xlu2 %987 }
 0x3a5   : > { %vm1034_vm1 = vcmp.ge.f32.partialorder %v2241_v54, %v988_v5  ;;  %vm1035_vm2 = vcmp.ge.f32.partialorder %v2245_v55, %v988_v5 }
 0x3a6   : > { %v1066_v7 = vsel %vm1034_vm1, -inf, %v2241_v54  ;;  %v1067_v10 = vsel %vm1035_vm2, -inf, %v2245_v55 }
 0x3a7   : > { %v1098_v11 = vmax.f32 %v1066_v7, %v1067_v10 }
 0x3a9   : > { %1099 = vmax.xlane.f32.xlu0 %v1098_v11 }
 0x3aa   : > { %v1012_v16 = vpop.xlane.xlu1 %1011 }
 0x3ab   : > { %vm1050_vm3 = vcmp.ge.f32.partialorder %v2249_v60, %v1012_v16  ;;  %vm1051_vm4 = vcmp.ge.f32.partialorder %v2253_v0, %v1012_v16 }
 0x3ac   : > { %v1082_v22 = vsel %vm1050_vm3, -inf, %v2249_v60  ;;  %v1083_v26 = vsel %vm1051_vm4, -inf, %v2253_v0  ;;  %v991_v28 = vpop.xlane.xlu0 %990 }
 0x3ad   : > { %v1122_v35 = vmax.f32 %v1082_v22, %v1083_v26  ;;  %vm1036_vm5 = vcmp.ge.f32.partialorder %v2255_v1, %v991_v28  ;;  %vm1037_vm6 = vcmp.ge.f32.partialorder %v2261_v3, %v991_v28 }
 0x3ae   : > { %v1068_v40 = vsel %vm1036_vm5, -inf, %v2255_v1  ;;  %v1069_v44 = vsel %vm1037_vm6, -inf, %v2261_v3 }
 0x3af   : > { %1123 = vmax.xlane.f32.xlu2 %v1122_v35  ;;  %v1101_v45 = vmax.f32 %v1068_v40, %v1069_v44 }
 0x3b1   : > { %1102 = vmax.xlane.f32.xlu1 %v1101_v45 }
 0x3b4   : > { %v994_v47 = vpop.xlane.xlu1 %993  ;;  %v1015_v49 = vpop.xlane.xlu2 %1014 }
 0x3b5   : > { %vm1038_vm7 = vcmp.ge.f32.partialorder %v2271_v13, %v994_v47  ;;  %vm1039_vm8 = vcmp.ge.f32.partialorder %v2277_v15, %v994_v47  ;;  %vm1052_vm9 = vcmp.ge.f32.partialorder %v2265_v8, %v1015_v49  ;;  %vm1053_vm10 = vcmp.ge.f32.partialorder %v2269_v12, %v1015_v49 }
 0x3b6   : > { %v1070_v62 = vsel %vm1038_vm7, -inf, %v2271_v13  ;;  %v1071_v4 = vsel %vm1039_vm8, -inf, %v2277_v15  ;;  %v1084_v7 = vsel %vm1052_vm9, -inf, %v2265_v8  ;;  %v1085_v10 = vsel %vm1053_vm10, -inf, %v2269_v12 }
 0x3b7   : > { %v1104_v5 = vmax.f32 %v1070_v62, %v1071_v4  ;;  %v1125_v11 = vmax.f32 %v1084_v7, %v1085_v10 }
 0x3b9   : > { %1105 = vmax.xlane.f32.xlu2 %v1104_v5  ;;  %1126 = vmax.xlane.f32.xlu0 %v1125_v11 }
 0x3bc   : > { %v1018_v16 = vpop.xlane.xlu0 %1017 }
 0x3bd   : > { %vm1054_vm11 = vcmp.ge.f32.partialorder %v2281_v20, %v1018_v16  ;;  %vm1055_vm12 = vcmp.ge.f32.partialorder %v2285_v23, %v1018_v16 }
 0x3be   : > { %v1086_v22 = vsel %vm1054_vm11, -inf, %v2281_v20  ;;  %v1087_v26 = vsel %vm1055_vm12, -inf, %v2285_v23 }
 0x3bf   : > { %v1128_v28 = vmax.f32 %v1086_v22, %v1087_v26 }
 0x3c1   : > { %1129 = vmax.xlane.f32.xlu1 %v1128_v28 }
 0x3c2   : > { %v1021_v35 = vpop.xlane.xlu1 %1020 }
 0x3c3   : > { %vm1056_vm13 = vcmp.ge.f32.partialorder %v2291_v30, %v1021_v35  ;;  %vm1057_vm14 = vcmp.ge.f32.partialorder %v2295_v33, %v1021_v35 }
 0x3c4   : > { %v1088_v40 = vsel %vm1056_vm13, -inf, %v2291_v30  ;;  %v1089_v44 = vsel %vm1057_vm14, -inf, %v2295_v33  ;;  %v997_v45 = vpop.xlane.xlu2 %996 }
 0x3c5   : > { %v1131_v47 = vmax.f32 %v1088_v40, %v1089_v44  ;;  %vm1040_vm15 = vcmp.ge.f32.partialorder %v2289_v29, %v997_v45  ;;  %vm1041_vm0 = vcmp.ge.f32.partialorder %v2299_v34, %v997_v45 }
 0x3c6   : > { %v1072_v49 = vsel %vm1040_vm15, -inf, %v2289_v29  ;;  %v1073_v62 = vsel %vm1041_vm0, -inf, %v2299_v34 }
 0x3c7   : > { %1132 = vmax.xlane.f32.xlu2 %v1131_v47  ;;  %v1107_v4 = vmax.f32 %v1072_v49, %v1073_v62 }
 0x3c9   : > { %1108 = vmax.xlane.f32.xlu0 %v1107_v4 }
 0x3ca   : > { %v1000_v5 = vpop.xlane.xlu0 %999 }
 0x3cb   : > { %vm1042_vm1 = vcmp.ge.f32.partialorder %v2305_v38, %v1000_v5  ;;  %vm1043_vm2 = vcmp.ge.f32.partialorder %v2309_v42, %v1000_v5 }
 0x3cc   : > { %v1024_v7 = vpop.xlane.xlu2 %1023  ;;  %v1074_v10 = vsel %vm1042_vm1, -inf, %v2305_v38  ;;  %v1075_v11 = vsel %vm1043_vm2, -inf, %v2309_v42 }
 0x3cd   : > { %vm1058_vm3 = vcmp.ge.f32.partialorder %v2311_v43, %v1024_v7  ;;  %vm1059_vm4 = vcmp.ge.f32.partialorder %v2315_v46, %v1024_v7  ;;  %v1110_v16 = vmax.f32 %v1074_v10, %v1075_v11 }
 0x3ce   : > { %v1090_v22 = vsel %vm1058_vm3, -inf, %v2311_v43  ;;  %v1091_v26 = vsel %vm1059_vm4, -inf, %v2315_v46 }
 0x3cf   : > { %1111 = vmax.xlane.f32.xlu1 %v1110_v16  ;;  %v1134_v28 = vmax.f32 %v1090_v22, %v1091_v26 }
 0x3d1   : > { %1135 = vmax.xlane.f32.xlu0 %v1134_v28 }
 0x3d2   : > { %v1027_v35 = vpop.xlane.xlu0 %1026  ;;  %v1003_v40 = vpop.xlane.xlu1 %1002 }
 0x3d3   : > { %vm1060_vm5 = vcmp.ge.f32.partialorder %v2327_v58, %v1027_v35  ;;  %vm1061_vm6 = vcmp.ge.f32.partialorder %v2331_v63, %v1027_v35  ;;  %vm1044_vm7 = vcmp.ge.f32.partialorder %v2321_v51, %v1003_v40  ;;  %vm1045_vm8 = vcmp.ge.f32.partialorder %v2325_v57, %v1003_v40 }
 0x3d4   : > { %v1092_v44 = vsel %vm1060_vm5, -inf, %v2327_v58  ;;  %v1093_v45 = vsel %vm1061_vm6, -inf, %v2331_v63  ;;  %v1006_v49 = vpop.xlane.xlu2 %1005  ;;  %v1076_v62 = vsel %vm1044_vm7, -inf, %v2321_v51  ;;  %v1077_v4 = vsel %vm1045_vm8, -inf, %v2325_v57 }
 0x3d5   : > { %v1137_v47 = vmax.f32 %v1092_v44, %v1093_v45  ;;  %vm1046_vm9 = vcmp.ge.f32.partialorder %v2333_v2, %v1006_v49  ;;  %vm1047_vm10 = vcmp.ge.f32.partialorder %v2341_v6, %v1006_v49  ;;  %v1113_v5 = vmax.f32 %v1076_v62, %v1077_v4 }
 0x3d6   : > { %v1078_v7 = vsel %vm1046_vm9, -inf, %v2333_v2  ;;  %v1079_v10 = vsel %vm1047_vm10, -inf, %v2341_v6 }
 0x3d7   : > { %1138 = vmax.xlane.f32.xlu1 %v1137_v47  ;;  %1114 = vmax.xlane.f32.xlu2 %v1113_v5  ;;  %v1116_v11 = vmax.f32 %v1078_v7, %v1079_v10 }
 0x3d9   : > { %1117 = vmax.xlane.f32.xlu0 %v1116_v11 }
 0x3da   : > { %v1030_v16 = vpop.xlane.xlu1 %1029 }
 0x3db   : > { %vm1062_vm11 = vcmp.ge.f32.partialorder %v2345_v14, %v1030_v16  ;;  %vm1063_vm12 = vcmp.ge.f32.partialorder %v2349_v19, %v1030_v16 }
 0x3dc   : > { %v1009_v22 = vpop.xlane.xlu0 %1008  ;;  %v1094_v26 = vsel %vm1062_vm11, -inf, %v2345_v14  ;;  %v1095_v28 = vsel %vm1063_vm12, -inf, %v2349_v19 }
 0x3dd   : > { %vm1048_vm13 = vcmp.ge.f32.partialorder %v2351_v21, %v1009_v22  ;;  %vm1049_vm14 = vcmp.ge.f32.partialorder %v2357_v24, %v1009_v22  ;;  %v1140_v44 = vmax.f32 %v1094_v26, %v1095_v28 }
 0x3de   : > { %v1080_v35 = vsel %vm1048_vm13, -inf, %v2351_v21  ;;  %v1081_v40 = vsel %vm1049_vm14, -inf, %v2357_v24 }
 0x3df   : > { %v1119_v45 = vmax.f32 %v1080_v35, %v1081_v40  ;;  %1141 = vmax.xlane.f32.xlu2 %v1140_v44 }
 0x3e1   : > { %1120 = vmax.xlane.f32.xlu1 %v1119_v45 }
 0x3e2   : > { %v1033_v47 = vpop.xlane.xlu2 %1032 }
 0x3e3   : > { %vm1064_vm15 = vcmp.ge.f32.partialorder %v2361_v31, %v1033_v47  ;;  %vm1065_vm0 = vcmp.ge.f32.partialorder %v2365_v32, %v1033_v47 }
 0x3e4   : > { %v1096_v49 = vsel %vm1064_vm15, -inf, %v2361_v31  ;;  %v1097_v62 = vsel %vm1065_vm0, -inf, %v2365_v32 }
 0x3e5   : > { %v1143_v4 = vmax.f32 %v1096_v49, %v1097_v62 }
 0x3e7   : > { %1144 = vmax.xlane.f32.xlu0 %v1143_v4 }
 0x41c   : > { %v1100_v5 = vpop.xlane.xlu0 %1099 }
 0x41d   : > { %vm1146_vm1 = vcmp.ge.f32.partialorder %v2241_v54, %v1100_v5  ;;  %vm1147_vm2 = vcmp.ge.f32.partialorder %v2245_v55, %v1100_v5 }
 0x41e   : > { %v1178_v7 = vsel %vm1146_vm1, -inf, %v2241_v54  ;;  %v1179_v10 = vsel %vm1147_vm2, -inf, %v2245_v55 }
 0x41f   : > { %v1210_v11 = vmax.f32 %v1178_v7, %v1179_v10 }
 0x421   : > { %1211 = vmax.xlane.f32.xlu1 %v1210_v11 }
 0x422   : > { %v1124_v16 = vpop.xlane.xlu2 %1123 }
 0x423   : > { %vm1162_vm3 = vcmp.ge.f32.partialorder %v2249_v60, %v1124_v16  ;;  %vm1163_vm4 = vcmp.ge.f32.partialorder %v2253_v0, %v1124_v16 }
 0x424   : > { %v1194_v22 = vsel %vm1162_vm3, -inf, %v2249_v60  ;;  %v1195_v26 = vsel %vm1163_vm4, -inf, %v2253_v0  ;;  %v1103_v28 = vpop.xlane.xlu1 %1102 }
 0x425   : > { %v1234_v35 = vmax.f32 %v1194_v22, %v1195_v26  ;;  %vm1148_vm5 = vcmp.ge.f32.partialorder %v2255_v1, %v1103_v28  ;;  %vm1149_vm6 = vcmp.ge.f32.partialorder %v2261_v3, %v1103_v28 }
 0x426   : > { %v1180_v40 = vsel %vm1148_vm5, -inf, %v2255_v1  ;;  %v1181_v44 = vsel %vm1149_vm6, -inf, %v2261_v3 }
 0x427   : > { %1235 = vmax.xlane.f32.xlu0 %v1234_v35  ;;  %v1213_v45 = vmax.f32 %v1180_v40, %v1181_v44 }
 0x429   : > { %1214 = vmax.xlane.f32.xlu2 %v1213_v45 }
 0x42c   : > { %v1106_v47 = vpop.xlane.xlu2 %1105  ;;  %v1127_v49 = vpop.xlane.xlu0 %1126 }
 0x42d   : > { %vm1150_vm7 = vcmp.ge.f32.partialorder %v2271_v13, %v1106_v47  ;;  %vm1151_vm8 = vcmp.ge.f32.partialorder %v2277_v15, %v1106_v47  ;;  %vm1164_vm9 = vcmp.ge.f32.partialorder %v2265_v8, %v1127_v49  ;;  %vm1165_vm10 = vcmp.ge.f32.partialorder %v2269_v12, %v1127_v49 }
 0x42e   : > { %v1182_v62 = vsel %vm1150_vm7, -inf, %v2271_v13  ;;  %v1183_v4 = vsel %vm1151_vm8, -inf, %v2277_v15  ;;  %v1196_v5 = vsel %vm1164_vm9, -inf, %v2265_v8  ;;  %v1197_v7 = vsel %vm1165_vm10, -inf, %v2269_v12 }
 0x42f   : > { %v1216_v10 = vmax.f32 %v1182_v62, %v1183_v4  ;;  %v1237_v11 = vmax.f32 %v1196_v5, %v1197_v7 }
 0x431   : > { %1217 = vmax.xlane.f32.xlu0 %v1216_v10  ;;  %1238 = vmax.xlane.f32.xlu1 %v1237_v11 }
 0x434   : > { %v1130_v16 = vpop.xlane.xlu1 %1129 }
 0x435   : > { %vm1166_vm11 = vcmp.ge.f32.partialorder %v2281_v20, %v1130_v16  ;;  %vm1167_vm12 = vcmp.ge.f32.partialorder %v2285_v23, %v1130_v16 }
 0x436   : > { %v1198_v22 = vsel %vm1166_vm11, -inf, %v2281_v20  ;;  %v1199_v26 = vsel %vm1167_vm12, -inf, %v2285_v23 }
 0x437   : > { %v1240_v28 = vmax.f32 %v1198_v22, %v1199_v26 }
 0x439   : > { %1241 = vmax.xlane.f32.xlu2 %v1240_v28 }
 0x43a   : > { %v1133_v35 = vpop.xlane.xlu2 %1132 }
 0x43b   : > { %vm1168_vm13 = vcmp.ge.f32.partialorder %v2291_v30, %v1133_v35  ;;  %vm1169_vm14 = vcmp.ge.f32.partialorder %v2295_v33, %v1133_v35 }
 0x43c   : > { %v1200_v40 = vsel %vm1168_vm13, -inf, %v2291_v30  ;;  %v1201_v44 = vsel %vm1169_vm14, -inf, %v2295_v33  ;;  %v1109_v45 = vpop.xlane.xlu0 %1108 }
 0x43d   : > { %v1243_v47 = vmax.f32 %v1200_v40, %v1201_v44  ;;  %vm1152_vm15 = vcmp.ge.f32.partialorder %v2289_v29, %v1109_v45  ;;  %vm1153_vm0 = vcmp.ge.f32.partialorder %v2299_v34, %v1109_v45 }
 0x43e   : > { %v1184_v49 = vsel %vm1152_vm15, -inf, %v2289_v29  ;;  %v1185_v62 = vsel %vm1153_vm0, -inf, %v2299_v34 }
 0x43f   : > { %1244 = vmax.xlane.f32.xlu0 %v1243_v47  ;;  %v1219_v4 = vmax.f32 %v1184_v49, %v1185_v62 }
 0x441   : > { %1220 = vmax.xlane.f32.xlu1 %v1219_v4 }
 0x442   : > { %v1112_v5 = vpop.xlane.xlu1 %1111 }
 0x443   : > { %vm1154_vm1 = vcmp.ge.f32.partialorder %v2305_v38, %v1112_v5  ;;  %vm1155_vm2 = vcmp.ge.f32.partialorder %v2309_v42, %v1112_v5 }
 0x444   : > { %v1136_v7 = vpop.xlane.xlu0 %1135  ;;  %v1186_v10 = vsel %vm1154_vm1, -inf, %v2305_v38  ;;  %v1187_v11 = vsel %vm1155_vm2, -inf, %v2309_v42 }
 0x445   : > { %vm1170_vm3 = vcmp.ge.f32.partialorder %v2311_v43, %v1136_v7  ;;  %vm1171_vm4 = vcmp.ge.f32.partialorder %v2315_v46, %v1136_v7  ;;  %v1222_v16 = vmax.f32 %v1186_v10, %v1187_v11 }
 0x446   : > { %v1202_v22 = vsel %vm1170_vm3, -inf, %v2311_v43  ;;  %v1203_v26 = vsel %vm1171_vm4, -inf, %v2315_v46 }
 0x447   : > { %1223 = vmax.xlane.f32.xlu2 %v1222_v16  ;;  %v1246_v28 = vmax.f32 %v1202_v22, %v1203_v26 }
 0x449   : > { %1247 = vmax.xlane.f32.xlu1 %v1246_v28 }
 0x44a   : > { %v1139_v35 = vpop.xlane.xlu1 %1138  ;;  %v1115_v40 = vpop.xlane.xlu2 %1114 }
 0x44b   : > { %vm1172_vm5 = vcmp.ge.f32.partialorder %v2327_v58, %v1139_v35  ;;  %vm1173_vm6 = vcmp.ge.f32.partialorder %v2331_v63, %v1139_v35  ;;  %vm1156_vm7 = vcmp.ge.f32.partialorder %v2321_v51, %v1115_v40  ;;  %vm1157_vm8 = vcmp.ge.f32.partialorder %v2325_v57, %v1115_v40 }
 0x44c   : > { %v1204_v44 = vsel %vm1172_vm5, -inf, %v2327_v58  ;;  %v1205_v45 = vsel %vm1173_vm6, -inf, %v2331_v63  ;;  %v1118_v49 = vpop.xlane.xlu0 %1117  ;;  %v1188_v62 = vsel %vm1156_vm7, -inf, %v2321_v51  ;;  %v1189_v4 = vsel %vm1157_vm8, -inf, %v2325_v57 }
 0x44d   : > { %v1249_v47 = vmax.f32 %v1204_v44, %v1205_v45  ;;  %vm1158_vm9 = vcmp.ge.f32.partialorder %v2333_v2, %v1118_v49  ;;  %vm1159_vm10 = vcmp.ge.f32.partialorder %v2341_v6, %v1118_v49  ;;  %v1225_v5 = vmax.f32 %v1188_v62, %v1189_v4 }
 0x44e   : > { %v1190_v7 = vsel %vm1158_vm9, -inf, %v2333_v2  ;;  %v1191_v10 = vsel %vm1159_vm10, -inf, %v2341_v6 }
 0x44f   : > { %1250 = vmax.xlane.f32.xlu2 %v1249_v47  ;;  %1226 = vmax.xlane.f32.xlu0 %v1225_v5  ;;  %v1228_v11 = vmax.f32 %v1190_v7, %v1191_v10  ;;  %v1290_v5 = vsub.f32 %v2241_v54, %v2369_v36  ;;  %v1291_v7 = vsub.f32 %v2245_v55, %v2369_v36 }
 0x451   : > { %1229 = vmax.xlane.f32.xlu1 %v1228_v11  ;;  %v1322_v10 = vmul.f32 1.442695, %v1290_v5  ;;  %v1324_v11 = vmul.f32 1.442695, %v1291_v7  ;;  %v1294_v5 = vsub.f32 %v2271_v13, %v2395_v56 }
 0x452   : > { %v1142_v16 = vpop.xlane.xlu2 %1141 }
 0x453   : > { %vm1174_vm11 = vcmp.ge.f32.partialorder %v2345_v14, %v1142_v16  ;;  %vm1175_vm12 = vcmp.ge.f32.partialorder %v2349_v19, %v1142_v16  ;;  %v1306_v16 = vsub.f32 %v2249_v60, %v2377_v50  ;;  %1952 = vpow2.f32 %v1322_v10 }
 0x454   : > { %v1121_v22 = vpop.xlane.xlu1 %1120  ;;  %v1206_v26 = vsel %vm1174_vm11, -inf, %v2345_v14  ;;  %v1207_v28 = vsel %vm1175_vm12, -inf, %v2349_v19  ;;  %1954 = vpow2.f32 %v1324_v11 }
 0x455   : > { %vm1160_vm13 = vcmp.ge.f32.partialorder %v2351_v21, %v1121_v22  ;;  %vm1161_vm14 = vcmp.ge.f32.partialorder %v2357_v24, %v1121_v22  ;;  %v1252_v44 = vmax.f32 %v1206_v26, %v1207_v28  ;;  %v1307_v22 = vsub.f32 %v2253_v0, %v2377_v50 }
 0x456   : > { %v1192_v35 = vsel %vm1160_vm13, -inf, %v2351_v21  ;;  %v1193_v40 = vsel %vm1161_vm14, -inf, %v2357_v24  ;;  %v1292_v26 = vsub.f32 %v2255_v1, %v2383_v41  ;;  %v1354_v28 = vmul.f32 1.442695, %v1306_v16 }
 0x457   : > { %v1231_v45 = vmax.f32 %v1192_v35, %v1193_v40  ;;  %1253 = vmax.xlane.f32.xlu0 %v1252_v44  ;;  %v1293_v35 = vsub.f32 %v2261_v3, %v2383_v41  ;;  %v1356_v40 = vmul.f32 1.442695, %v1307_v22  ;;  %v1330_v22 = vmul.f32 1.442695, %v1294_v5 }
 0x458   : > { %v1326_v36 = vmul.f32 1.442695, %v1292_v26  ;;  %1956 = vpow2.f32 %v1354_v28  ;;  %v1310_v28 = vsub.f32 %v2281_v20, %v2409_v9  ;;  %v1313_v5 = vsub.f32 %v2295_v33, %v2417_v17 }
 0x459   : > { %1232 = vmax.xlane.f32.xlu2 %v1231_v45  ;;  %v1953_v44 = vpop.eup %1952  ;;  %1958 = vpow2.f32 %v1356_v40 }
 0x45a   : > { %v1145_v47 = vpop.xlane.xlu0 %1144  ;;  %1960 = vpow2.f32 %v1326_v36 }
 0x45b   : > { %vm1176_vm15 = vcmp.ge.f32.partialorder %v2361_v31, %v1145_v47  ;;  %vm1177_vm0 = vcmp.ge.f32.partialorder %v2365_v32, %v1145_v47  ;;  %v1955_v47 = vpop.eup %1954 }
 0x45c   : > { %v1208_v49 = vsel %vm1176_vm15, -inf, %v2361_v31  ;;  %v1209_v62 = vsel %vm1177_vm0, -inf, %v2365_v32 }
 0x45d   : > { %v1255_v4 = vmax.f32 %v1208_v49, %v1209_v62  ;;  %v1328_v49 = vmul.f32 1.442695, %v1293_v35 }
 0x45e   : > { %v1957_v7 = vpop.eup %1956 }
 0x45f   : > { %1256 = vmax.xlane.f32.xlu1 %v1255_v4  ;;  %v1308_v4 = vsub.f32 %v2265_v8, %v2393_v53  ;;  %1962 = vpow2.f32 %v1328_v49  ;;  %v1959_v16 = vpop.eup %1958  ;;  %v1362_v49 = vmul.f32 1.442695, %v1310_v28 }
 0x460   : > { %v1961_v40 = vpop.eup %1960 }
 0x461   : > { %v1358_v10 = vmul.f32 1.442695, %v1308_v4 }
 0x463   : > { %1964 = vpow2.f32 %v1358_v10  ;;  %v1296_v10 = vsub.f32 %v2289_v29, %v2423_v18 }
 0x464   : > { %1966 = vpow2.f32 %v1330_v22 }
 0x494   : > { %v1212_v45 = vpop.xlane.xlu1 %1211 }
 0x495   : > { %vm1258_vm1 = vcmp.ge.f32.partialorder %v2241_v54, %v1212_v45  ;;  %vm1259_vm2 = vcmp.ge.f32.partialorder %v2245_v55, %v1212_v45  ;;  %v1295_v54 = vsub.f32 %v2277_v15, %v2395_v56  ;;  %v1309_v55 = vsub.f32 %v2269_v12, %v2393_v53 }
 0x496   : > { %v2895_v50 = vsel %vm1258_vm1, %v1953_v44, 0.0  ;;  %v2897_v62 = vsel %vm1259_vm2, %v1955_v47, 0.0  ;;  %v1311_v53 = vsub.f32 %v2285_v23, %v2409_v9 }
 0x497   : > { %v1418_v41 = vadd.f32 %v2897_v62, %v2895_v50  ;;  %v1332_v26 = vmul.f32 1.442695, %v1295_v54  ;;  %v1360_v44 = vmul.f32 1.442695, %v1309_v55 }
 0x498   : > { %v1364_v4 = vmul.f32 1.442695, %v1311_v53  ;;  %v1334_v53 = vmul.f32 1.442695, %v1296_v10 }
 0x499   : > { %1419 = vadd.xlane.f32.xlu2 %v1418_v41  ;;  %1968 = vpow2.f32 %v1332_v26  ;;  %v1312_v41 = vsub.f32 %v2291_v30, %v2417_v17  ;;  %v1297_v17 = vsub.f32 %v2299_v34, %v2423_v18  ;;  %v1314_v18 = vsub.f32 %v2311_v43, %v2433_v37 }
 0x49a   : > { %v1236_v11 = vpop.xlane.xlu0 %1235  ;;  %1970 = vpow2.f32 %v1360_v44 }
 0x49b   : > { %vm1274_vm3 = vcmp.ge.f32.partialorder %v2249_v60, %v1236_v11  ;;  %vm1275_vm4 = vcmp.ge.f32.partialorder %v2253_v0, %v1236_v11  ;;  %v1963_v60 = vpop.eup %1962  ;;  %1972 = vpow2.f32 %v1362_v49 }
 0x49c   : > { %v2913_v35 = vsel %vm1274_vm3, %v1957_v7, 0.0  ;;  %v2915_v56 = vsel %vm1275_vm4, %v1959_v16, 0.0  ;;  %v1215_v36 = vpop.xlane.xlu2 %1214  ;;  %1974 = vpow2.f32 %v1364_v4  ;;  %v1366_v7 = vmul.f32 1.442695, %v1312_v41 }
 0x49d   : > { %v1442_v45 = vadd.f32 %v2915_v56, %v2913_v35  ;;  %vm1260_vm5 = vcmp.ge.f32.partialorder %v2255_v1, %v1215_v36  ;;  %vm1261_vm6 = vcmp.ge.f32.partialorder %v2261_v3, %v1215_v36  ;;  %v1965_v1 = vpop.eup %1964  ;;  %v1299_v4 = vsub.f32 %v2309_v42, %v2435_v39 }
 0x49e   : > { %v2923_v0 = vsel %vm1260_vm5, %v1961_v40, 0.0  ;;  %v2925_v47 = vsel %vm1261_vm6, %v1963_v60, 0.0  ;;  %v1967_v3 = vpop.eup %1966  ;;  %1976 = vpow2.f32 %v1366_v7  ;;  %v1298_v60 = vsub.f32 %v2305_v38, %v2435_v39 }
 0x49f   : > { %1443 = vadd.xlane.f32.xlu1 %v1442_v45  ;;  %v1421_v9 = vadd.f32 %v2925_v47, %v2923_v0  ;;  %v1969_v55 = vpop.eup %1968  ;;  %v1336_v45 = vmul.f32 1.442695, %v1297_v17 }
 0x4a0   : > { %v1971_v16 = vpop.eup %1970 }
 0x4a1   : > { %1422 = vadd.xlane.f32.xlu0 %v1421_v9  ;;  %v1973_v44 = vpop.eup %1972 }
 0x4a4   : > { %v1218_v54 = vpop.xlane.xlu0 %1217  ;;  %v1239_v11 = vpop.xlane.xlu1 %1238 }
 0x4a5   : > { %vm1262_vm7 = vcmp.ge.f32.partialorder %v2271_v13, %v1218_v54  ;;  %vm1263_vm8 = vcmp.ge.f32.partialorder %v2277_v15, %v1218_v54  ;;  %vm1276_vm9 = vcmp.ge.f32.partialorder %v2265_v8, %v1239_v11  ;;  %vm1277_vm10 = vcmp.ge.f32.partialorder %v2269_v12, %v1239_v11  ;;  %v1975_v12 = vpop.eup %1974 }
 0x4a6   : > { %v2939_v22 = vsel %vm1262_vm7, %v1967_v3, 0.0  ;;  %v2941_v26 = vsel %vm1263_vm8, %v1969_v55, 0.0  ;;  %v2945_v28 = vsel %vm1276_vm9, %v1965_v1, 0.0  ;;  %v2947_v40 = vsel %vm1277_vm10, %v1971_v16, 0.0  ;;  %v1977_v1 = vpop.eup %1976 }
 0x4a7   : > { %v1424_v13 = vadd.f32 %v2941_v26, %v2939_v22  ;;  %v1368_v15 = vmul.f32 1.442695, %v1313_v5  ;;  %v1445_v8 = vadd.f32 %v2947_v40, %v2945_v28  ;;  %v1338_v3 = vmul.f32 1.442695, %v1298_v60 }
 0x4a8   : > { %v1340_v5 = vmul.f32 1.442695, %v1299_v4  ;;  %v1318_v60 = vsub.f32 %v2345_v14, %v2473_v25 }
 0x4a9   : > { %1425 = vadd.xlane.f32.xlu1 %v1424_v13  ;;  %1446 = vadd.xlane.f32.xlu2 %v1445_v8  ;;  %1978 = vpow2.f32 %v1368_v15  ;;  %v1302_v8 = vsub.f32 %v2333_v2, %v2459_v61 }
 0x4aa   : > { %1980 = vpow2.f32 %v1334_v53 }
 0x4ab   : > { %1982 = vpow2.f32 %v1336_v45 }
 0x4ac   : > { %v1242_v36 = vpop.xlane.xlu2 %1241 }
 0x4ad   : > { %vm1278_vm11 = vcmp.ge.f32.partialorder %v2281_v20, %v1242_v36  ;;  %vm1279_vm12 = vcmp.ge.f32.partialorder %v2285_v23, %v1242_v36  ;;  %v1315_v20 = vsub.f32 %v2315_v46, %v2433_v37  ;;  %v1370_v23 = vmul.f32 1.442695, %v1314_v18 }
 0x4ae   : > { %v2959_v49 = vsel %vm1278_vm11, %v1973_v44, 0.0  ;;  %v2961_v9 = vsel %vm1279_vm12, %v1975_v12, 0.0  ;;  %v1346_v18 = vmul.f32 1.442695, %v1302_v8 }
 0x4af   : > { %v1448_v41 = vadd.f32 %v2961_v9, %v2959_v49  ;;  %v1979_v55 = vpop.eup %1978  ;;  %1984 = vpow2.f32 %v1370_v23  ;;  %v1372_v39 = vmul.f32 1.442695, %v1315_v20 }
 0x4b0   : > { %v1981_v11 = vpop.eup %1980  ;;  %1986 = vpow2.f32 %v1338_v3  ;;  %v1304_v3 = vsub.f32 %v2351_v21, %v2475_v27 }
 0x4b1   : > { %1449 = vadd.xlane.f32.xlu0 %v1448_v41  ;;  %v1983_v17 = vpop.eup %1982  ;;  %1988 = vpow2.f32 %v1340_v5  ;;  %v1319_v41 = vsub.f32 %v2349_v19, %v2473_v25 }
 0x4b2   : > { %v1245_v54 = vpop.xlane.xlu0 %1244  ;;  %1990 = vpow2.f32 %v1372_v39  ;;  %v1350_v39 = vmul.f32 1.442695, %v1304_v3 }
 0x4b3   : > { %vm1280_vm13 = vcmp.ge.f32.partialorder %v2291_v30, %v1245_v54  ;;  %vm1281_vm14 = vcmp.ge.f32.partialorder %v2295_v33, %v1245_v54  ;;  %v1300_v30 = vsub.f32 %v2321_v51, %v2451_v59  ;;  %v1301_v33 = vsub.f32 %v2325_v57, %v2451_v59 }
 0x4b4   : > { %v2971_v7 = vsel %vm1280_vm13, %v1977_v1, 0.0  ;;  %v2973_v10 = vsel %vm1281_vm14, %v1979_v55, 0.0  ;;  %v1221_v37 = vpop.xlane.xlu1 %1220  ;;  %v1378_v54 = vmul.f32 1.442695, %v1318_v60 }
 0x4b5   : > { %v1451_v16 = vadd.f32 %v2973_v10, %v2971_v7  ;;  %vm1264_vm15 = vcmp.ge.f32.partialorder %v2289_v29, %v1221_v37  ;;  %vm1265_vm0 = vcmp.ge.f32.partialorder %v2299_v34, %v1221_v37  ;;  %v1303_v34 = vsub.f32 %v2341_v6, %v2459_v61  ;;  %v1985_v44 = vpop.eup %1984 }
 0x4b6   : > { %v2983_v13 = vsel %vm1264_vm15, %v1981_v11, 0.0  ;;  %v2985_v15 = vsel %vm1265_vm0, %v1983_v17, 0.0  ;;  %v1987_v12 = vpop.eup %1986  ;;  %v1342_v53 = vmul.f32 1.442695, %v1300_v30  ;;  %v1344_v59 = vmul.f32 1.442695, %v1301_v33 }
 0x4b7   : > { %1452 = vadd.xlane.f32.xlu1 %v1451_v16  ;;  %v1427_v29 = vadd.f32 %v2985_v15, %v2983_v13  ;;  %v1989_v45 = vpop.eup %1988  ;;  %v1348_v4 = vmul.f32 1.442695, %v1303_v34  ;;  %v1320_v37 = vsub.f32 %v2361_v31, %v2489_v48  ;;  %v1321_v17 = vsub.f32 %v2365_v32, %v2489_v48 }
 0x4b8   : > { %v1991_v1 = vpop.eup %1990  ;;  %1992 = vpow2.f32 %v1342_v53 }
 0x4b9   : > { %1428 = vadd.xlane.f32.xlu2 %v1427_v29  ;;  %1994 = vpow2.f32 %v1344_v59 }
 0x4ba   : > { %v1224_v36 = vpop.xlane.xlu2 %1223  ;;  %1996 = vpow2.f32 %v1346_v18 }
 0x4bb   : > { %vm1266_vm1 = vcmp.ge.f32.partialorder %v2305_v38, %v1224_v36  ;;  %vm1267_vm2 = vcmp.ge.f32.partialorder %v2309_v42, %v1224_v36  ;;  %v1305_v42 = vsub.f32 %v2357_v24, %v2475_v27  ;;  %1998 = vpow2.f32 %v1348_v4 }
 0x4bc   : > { %v1248_v61 = vpop.xlane.xlu1 %1247  ;;  %v2999_v20 = vsel %vm1266_vm1, %v1987_v12, 0.0  ;;  %v3001_v23 = vsel %vm1267_vm2, %v1989_v45, 0.0  ;;  %v1317_v27 = vsub.f32 %v2331_v63, %v2449_v52  ;;  %2000 = vpow2.f32 %v1378_v54 }
 0x4bd   : > { %vm1282_vm3 = vcmp.ge.f32.partialorder %v2311_v43, %v1248_v61  ;;  %vm1283_vm4 = vcmp.ge.f32.partialorder %v2315_v46, %v1248_v61  ;;  %v1430_v38 = vadd.f32 %v3001_v23, %v2999_v20  ;;  %v1380_v43 = vmul.f32 1.442695, %v1319_v41 }
 0x4be   : > { %v3011_v25 = vsel %vm1282_vm3, %v1985_v44, 0.0  ;;  %v3013_v5 = vsel %vm1283_vm4, %v1991_v1, 0.0  ;;  %v1316_v46 = vsub.f32 %v2327_v58, %v2449_v52  ;;  %v1352_v11 = vmul.f32 1.442695, %v1305_v42  ;;  %v1993_v16 = vpop.eup %1992 }
 0x4bf   : > { %1431 = vadd.xlane.f32.xlu0 %v1430_v38  ;;  %v1454_v55 = vadd.f32 %v3013_v5, %v3011_v25  ;;  %2002 = vpow2.f32 %v1380_v43  ;;  %v1995_v8 = vpop.eup %1994  ;;  %v1376_v34 = vmul.f32 1.442695, %v1317_v27  ;;  %v1382_v36 = vmul.f32 1.442695, %v1320_v37 }
 0x4c0   : > { %v1374_v29 = vmul.f32 1.442695, %v1316_v46  ;;  %2004 = vpow2.f32 %v1350_v39  ;;  %v1997_v52 = vpop.eup %1996 }
 0x4c1   : > { %1455 = vadd.xlane.f32.xlu2 %v1454_v55  ;;  %2006 = vpow2.f32 %v1352_v11  ;;  %v1999_v59 = vpop.eup %1998 }
 0x4c2   : > { %v1227_v30 = vpop.xlane.xlu0 %1226  ;;  %v1251_v33 = vpop.xlane.xlu2 %1250  ;;  %2008 = vpow2.f32 %v1374_v29 }
 0x4c3   : > { %vm1268_vm5 = vcmp.ge.f32.partialorder %v2321_v51, %v1227_v30  ;;  %vm1269_vm6 = vcmp.ge.f32.partialorder %v2325_v57, %v1227_v30  ;;  %v1384_v51 = vmul.f32 1.442695, %v1321_v17  ;;  %v2001_v18 = vpop.eup %2000  ;;  %2010 = vpow2.f32 %v1376_v34 }
 0x4c4   : > { %v1230_v44 = vpop.xlane.xlu1 %1229  ;;  %v3027_v12 = vsel %vm1268_vm5, %v1993_v16, 0.0  ;;  %v3029_v53 = vsel %vm1269_vm6, %v1995_v8, 0.0  ;;  %2012 = vpow2.f32 %v1382_v36  ;;  %vm1284_vm13 = vcmp.ge.f32.partialorder %v2327_v58, %v1251_v33 }
 0x4c5   : > { %vm1270_vm7 = vcmp.ge.f32.partialorder %v2333_v2, %v1230_v44  ;;  %vm1271_vm8 = vcmp.ge.f32.partialorder %v2341_v6, %v1230_v44  ;;  %v1433_v48 = vadd.f32 %v3029_v53, %v3027_v12  ;;  %v2003_v4 = vpop.eup %2002  ;;  %2014 = vpow2.f32 %v1384_v51 }
 0x4c6   : > { %v3035_v45 = vsel %vm1270_vm7, %v1997_v52, 0.0  ;;  %v3037_v57 = vsel %vm1271_vm8, %v1999_v59, 0.0  ;;  %v2005_v41 = vpop.eup %2004  ;;  %vm1285_vm14 = vcmp.ge.f32.partialorder %v2331_v63, %v1251_v33 }
 0x4c7   : > { %1434 = vadd.xlane.f32.xlu1 %v1433_v48  ;;  %v1436_v60 = vadd.f32 %v3037_v57, %v3035_v45  ;;  %v2007_v2 = vpop.eup %2006 }
 0x4c8   : > { %v2009_v54 = vpop.eup %2008 }
 0x4c9   : > { %1437 = vadd.xlane.f32.xlu2 %v1436_v60  ;;  %v3067_v11 = vsel %vm1284_vm13, %v2009_v54, 0.0 }
 0x4ca   : > { %v1254_v6 = vpop.xlane.xlu0 %1253 }
 0x4cb   : > { %vm1286_vm9 = vcmp.ge.f32.partialorder %v2345_v14, %v1254_v6  ;;  %vm1287_vm10 = vcmp.ge.f32.partialorder %v2349_v19, %v1254_v6  ;;  %v2011_v19 = vpop.eup %2010 }
 0x4cc   : > { %v1233_v61 = vpop.xlane.xlu2 %1232  ;;  %v3045_v1 = vsel %vm1286_vm9, %v2001_v18, 0.0  ;;  %v3047_v3 = vsel %vm1287_vm10, %v2003_v4, 0.0  ;;  %v2013_v43 = vpop.eup %2012  ;;  %v3069_v58 = vsel %vm1285_vm14, %v2011_v19, 0.0 }
 0x4cd   : > { %vm1272_vm11 = vcmp.ge.f32.partialorder %v2351_v21, %v1233_v61  ;;  %vm1273_vm12 = vcmp.ge.f32.partialorder %v2357_v24, %v1233_v61  ;;  %v1460_v55 = vadd.f32 %v3047_v3, %v3045_v1  ;;  %v2015_v24 = vpop.eup %2014  ;;  %v1457_v63 = vadd.f32 %v3069_v58, %v3067_v11 }
 0x4ce   : > { %v3049_v38 = vsel %vm1272_vm11, %v2005_v41, 0.0  ;;  %v3051_v42 = vsel %vm1273_vm12, %v2007_v2, 0.0 }
 0x4cf   : > { %v1439_v14 = vadd.f32 %v3051_v42, %v3049_v38  ;;  %1461 = vadd.xlane.f32.xlu1 %v1460_v55 }
 0x4d1   : > { %1440 = vadd.xlane.f32.xlu0 %v1439_v14 }
 0x4d2   : > { %v1257_v21 = vpop.xlane.xlu1 %1256 }
 0x4d3   : > { %vm1288_vm15 = vcmp.ge.f32.partialorder %v2361_v31, %v1257_v21  ;;  %vm1289_vm0 = vcmp.ge.f32.partialorder %v2365_v32, %v1257_v21 }
 0x4d4   : > { %v3061_v46 = vsel %vm1288_vm15, %v2013_v43, 0.0  ;;  %v3063_v39 = vsel %vm1289_vm0, %v2015_v24, 0.0 }
 0x4d5   : > { %v1463_v27 = vadd.f32 %v3063_v39, %v3061_v46 }
 0x4d7   : > { %1464 = vadd.xlane.f32.xlu2 %v1463_v27 }
 0x4d9   : > { %1458 = vadd.xlane.f32.xlu0 %v1457_v63 }
 0x50c   : > { %v1420_v31 = vpop.xlane.xlu2 %1419 }
 0x50d   : > { %2016 = vrcp.f32 %v1420_v31  ;;  %v1477_v33 = vand.u32 2147483648, %v1420_v31  ;;  %v1475_v29 = vand.u32 2147483647, %v1420_v31  ;;  %vm1471_vm2 = vweird.f32 %v1420_v31 }
 0x50f   : > { %v1478_v44 = vor.u32 1.1754944e-38, %v1477_v33  ;;  %vm1476_vm4 = vcmp.eq.f32.partialorder %v1475_v29, 8.507059e+37 }
 0x512   : > { %v1444_v37 = vpop.xlane.xlu1 %1443 }
 0x513   : > { %v2017_v32 = vpop.eup %2016  ;;  %2018 = vrcp.f32 %v1444_v37  ;;  %v1597_v41 = vand.u32 2147483648, %v1444_v37  ;;  %v1595_v54 = vand.u32 2147483647, %v1444_v37  ;;  %vm1591_vm6 = vweird.f32 %v1444_v37 }
 0x514   : > { %v1467_v16 = vmul.f32 %v2017_v32, %v1420_v31  ;;  %v1423_v30 = vpop.xlane.xlu0 %1422  ;;  %vm1472_vm1 = vweird.f32 %v2017_v32 }
 0x515   : > { %2020 = vrcp.f32 %v1423_v30  ;;  %vm1473_vm3 = vmor %vm1471_vm2, %vm1472_vm1  ;;  %v1490_v21 = vand.u32 2147483647, %v1423_v30  ;;  %vm1596_vm9 = vcmp.eq.f32.partialorder %v1595_v54, 8.507059e+37  ;;  %vm1486_vm10 = vweird.f32 %v1423_v30 }
 0x516   : > { %v1468_v17 = vsub.f32 1.0, %v1467_v16 }
 0x517   : > { %vm1491_vm12 = vcmp.eq.f32.partialorder %v1490_v21, 8.507059e+37 }
 0x518   : > { %v1469_v8 = vmul.f32 %v2017_v32, %v1468_v17 }
 0x519   : > { %v2019_v52 = vpop.eup %2018 }
 0x51a   : > { %v1470_v34 = vadd.f32 %v2017_v32, %v1469_v8  ;;  %v1587_v59 = vmul.f32 %v2019_v52, %v1444_v37  ;;  %vm1592_vm5 = vweird.f32 %v2019_v52 }
 0x51b   : > { %v2021_v48 = vpop.eup %2020  ;;  %vm1593_vm7 = vmor %vm1591_vm6, %vm1592_vm5 }
 0x51c   : > { %v1474_v36 = vsel %vm1473_vm3, %v2017_v32, %v1470_v34  ;;  %v1588_v18 = vsub.f32 1.0, %v1587_v59  ;;  %v1482_v2 = vmul.f32 %v2021_v48, %v1423_v30  ;;  %v1426_v6 = vpop.xlane.xlu1 %1425  ;;  %v1447_v55 = vpop.xlane.xlu2 %1446  ;;  %vm1487_vm8 = vweird.f32 %v2021_v48 }
 0x51d   : > { %v1479_v51 = vsel %vm1476_vm4, %v1478_v44, %v1474_v36  ;;  %2022 = vrcp.f32 %v1426_v6  ;;  %vm1488_vm11 = vmor %vm1486_vm10, %vm1487_vm8  ;;  %v1507_v59 = vand.u32 2147483648, %v1426_v6  ;;  %vm1501_vm14 = vweird.f32 %v1426_v6 }
 0x51e   : > { %v1706_v60 = vmul.f32 %v1479_v51, %v2895_v50  ;;  %v1707_v4 = vmul.f32 %v1479_v51, %v2897_v62  ;;  %v1589_v61 = vmul.f32 %v2019_v52, %v1588_v18  ;;  %v1483_v14 = vsub.f32 1.0, %v1482_v2 }
 0x51f   : > { %2024 = vrcp.f32 %v1447_v55  ;;  %v1492_v50 = vand.u32 2147483648, %v1423_v30  ;;  %v1598_v62 = vor.u32 1.1754944e-38, %v1597_v41  ;;  %v1610_v51 = vand.u32 2147483647, %v1447_v55 }
 0x520   : > { %1738 = vst [vmem:[%s3078_s29] sm:$0xff] %v1706_v60  ;;  %v1590_v19 = vadd.f32 %v2019_v52, %v1589_v61  ;;  %v1484_v43 = vmul.f32 %v2021_v48, %v1483_v14  ;;  %vm1606_vm0 = vweird.f32 %v1447_v55 }
 0x521   : > { %1739 = vst [vmem:[%s3078_s29 + $0x8] sm:$0xff] %v1707_v4  ;;  %v1493_v17 = vor.u32 1.1754944e-38, %v1492_v50  ;;  %vm1611_vm3 = vcmp.eq.f32.partialorder %v1610_v51, 8.507059e+37 }
 0x522   : > { %v1594_v24 = vsel %vm1593_vm7, %v2019_v52, %v1590_v19  ;;  %v1485_v63 = vadd.f32 %v2021_v48, %v1484_v43 }
 0x523   : > { %v1599_v27 = vsel %vm1596_vm9, %v1598_v62, %v1594_v24  ;;  %v2023_v32 = vpop.eup %2022 }
 0x524   : > { %v3082_v31 = vpop.xlane.xlu0 %1449  ;;  %v1722_v16 = vmul.f32 %v1599_v27, %v2913_v35  ;;  %v1723_v37 = vmul.f32 %v1599_v27, %v2915_v56  ;;  %v1489_v8 = vsel %vm1488_vm11, %v2021_v48, %v1485_v63  ;;  %v1497_v29 = vmul.f32 %v2023_v32, %v1426_v6 }
 0x525   : > { %2026 = vrcp.f32 %v3082_v31  ;;  %v2025_v33 = vpop.eup %2024  ;;  %v1494_v52 = vsel %vm1491_vm12, %v1493_v17, %v1489_v8  ;;  %v1505_v56 = vand.u32 2147483647, %v1426_v6  ;;  %vm1502_vm13 = vweird.f32 %v2023_v32 }
 0x526   : > { %1754 = vst [vmem:[%s3078_s29 + $0x80] sm:$0xff] %v1722_v16  ;;  %v1602_v30 = vmul.f32 %v2025_v33, %v1447_v55  ;;  %v1708_v34 = vmul.f32 %v1494_v52, %v2923_v0  ;;  %v1709_v35 = vmul.f32 %v1494_v52, %v2925_v47  ;;  %v1498_v44 = vsub.f32 1.0, %v1497_v29  ;;  %vm1503_vm1 = vmor %vm1501_vm14, %vm1502_vm13 }
 0x527   : > { %1755 = vst [vmem:[%s3078_s29 + $0x88] sm:$0xff] %v1723_v37  ;;  %v1612_v48 = vand.u32 2147483648, %v1447_v55  ;;  %vm1607_vm15 = vweird.f32 %v2025_v33  ;;  %vm1506_vm2 = vcmp.eq.f32.partialorder %v1505_v56, 8.507059e+37  ;;  %v1508_v47 = vor.u32 1.1754944e-38, %v1507_v59 }
 0x528   : > { %v1603_v36 = vsub.f32 1.0, %v1602_v30  ;;  %1740 = vst [vmem:[%s3078_s29 + $0x10] sm:$0xff] %v1708_v34  ;;  %v1499_v18 = vmul.f32 %v2023_v32, %v1498_v44  ;;  %vm1608_vm4 = vmor %vm1606_vm0, %vm1607_vm15  ;;  %v1625_v19 = vand.u32 2147483647, %v3082_v31  ;;  %v1627_v43 = vand.u32 2147483648, %v3082_v31 }
 0x529   : > { %1741 = vst [vmem:[%s3078_s29 + $0x18] sm:$0xff] %v1709_v35  ;;  %v1613_v14 = vor.u32 1.1754944e-38, %v1612_v48  ;;  %vm1621_vm6 = vweird.f32 %v3082_v31 }
 0x52a   : > { %v1604_v4 = vmul.f32 %v2025_v33, %v1603_v36  ;;  %v3093_v41 = vpop.xlane.xlu1 %1452  ;;  %v1500_v2 = vadd.f32 %v2023_v32, %v1499_v18  ;;  %vm1626_vm8 = vcmp.eq.f32.partialorder %v1625_v19, 8.507059e+37 }
 0x52b   : > { %v2027_v60 = vpop.eup %2026  ;;  %2028 = vrcp.f32 %v3093_v41  ;;  %v1642_v52 = vand.u32 2147483648, %v3093_v41  ;;  %v1640_v44 = vand.u32 2147483647, %v3093_v41  ;;  %vm1636_vm10 = vweird.f32 %v3093_v41 }
 0x52c   : > { %v1617_v0 = vmul.f32 %v2027_v60, %v3082_v31  ;;  %v1605_v61 = vadd.f32 %v2025_v33, %v1604_v4  ;;  %v1504_v54 = vsel %vm1503_vm1, %v2023_v32, %v1500_v2  ;;  %v3098_v50 = vpop.xlane.xlu2 %1428  ;;  %vm1622_vm5 = vweird.f32 %v2027_v60 }
 0x52d   : > { %v1509_v55 = vsel %vm1506_vm2, %v1508_v47, %v1504_v54  ;;  %2030 = vrcp.f32 %v3098_v50  ;;  %vm1623_vm7 = vmor %vm1621_vm6, %vm1622_vm5  ;;  %v1643_v36 = vor.u32 1.1754944e-38, %v1642_v52  ;;  %vm1641_vm12 = vcmp.eq.f32.partialorder %v1640_v44, 8.507059e+37 }
 0x52e   : > { %v1618_v6 = vsub.f32 1.0, %v1617_v0  ;;  %v1609_v62 = vsel %vm1608_vm4, %v2025_v33, %v1605_v61  ;;  %v1710_v21 = vmul.f32 %v1509_v55, %v2939_v22  ;;  %v1711_v24 = vmul.f32 %v1509_v55, %v2941_v26 }
 0x52f   : > { %v1614_v27 = vsel %vm1611_vm3, %v1613_v14, %v1609_v62  ;;  %v1628_v33 = vor.u32 1.1754944e-38, %v1627_v43  ;;  %vm1516_vm13 = vweird.f32 %v3098_v50 }
 0x530   : > { %v1619_v63 = vmul.f32 %v2027_v60, %v1618_v6  ;;  %v1724_v32 = vmul.f32 %v1614_v27, %v2945_v28  ;;  %v1725_v16 = vmul.f32 %v1614_v27, %v2947_v40  ;;  %1742 = vst [vmem:[%s3078_s29 + $0x20] sm:$0xff] %v1710_v21 }
 0x531   : > { %v2029_v37 = vpop.eup %2028  ;;  %1743 = vst [vmem:[%s3078_s29 + $0x28] sm:$0xff] %v1711_v24 }
 0x532   : > { %v1620_v17 = vadd.f32 %v2027_v60, %v1619_v63  ;;  %v1632_v22 = vmul.f32 %v2029_v37, %v3093_v41  ;;  %1756 = vst [vmem:[%s3078_s29 + $0x90] sm:$0xff] %v1724_v32  ;;  %v3111_v8 = vpop.xlane.xlu0 %1431  ;;  %vm1637_vm9 = vweird.f32 %v2029_v37 }
 0x533   : > { %1757 = vst [vmem:[%s3078_s29 + $0x98] sm:$0xff] %v1725_v16  ;;  %2032 = vrcp.f32 %v3111_v8  ;;  %v2031_v34 = vpop.eup %2030  ;;  %vm1638_vm11 = vmor %vm1636_vm10, %vm1637_vm9  ;;  %vm1531_vm0 = vweird.f32 %v3111_v8 }
 0x534   : > { %v1624_v26 = vsel %vm1623_vm7, %v2027_v60, %v1620_v17  ;;  %v1633_v40 = vsub.f32 1.0, %v1632_v22  ;;  %v3118_v30 = vpop.xlane.xlu2 %1455  ;;  %v1512_v56 = vmul.f32 %v2031_v34, %v3098_v50  ;;  %vm1517_vm14 = vweird.f32 %v2031_v34 }
 0x535   : > { %v1629_v28 = vsel %vm1626_vm8, %v1628_v33, %v1624_v26  ;;  %2034 = vrcp.f32 %v3118_v30  ;;  %vm1518_vm1 = vmor %vm1516_vm13, %vm1517_vm14  ;;  %v1655_v62 = vand.u32 2147483647, %v3118_v30  ;;  %v1657_v63 = vand.u32 2147483648, %v3118_v30 }
 0x536   : > { %v1726_v29 = vmul.f32 %v1629_v28, %v2959_v49  ;;  %v1727_v31 = vmul.f32 %v1629_v28, %v2961_v9  ;;  %v1634_v35 = vmul.f32 %v2029_v37, %v1633_v40  ;;  %v1520_v49 = vand.u32 2147483647, %v3098_v50 }
 0x537   : > { %v1522_v9 = vand.u32 2147483648, %v3098_v50  ;;  %v1513_v51 = vsub.f32 1.0, %v1512_v56  ;;  %vm1651_vm6 = vweird.f32 %v3118_v30  ;;  %vm1656_vm8 = vcmp.eq.f32.partialorder %v1655_v62, 8.507059e+37 }
 0x538   : > { %1758 = vst [vmem:[%s3078_s29 + $0xa0] sm:$0xff] %v1726_v29  ;;  %v1635_v59 = vadd.f32 %v2029_v37, %v1634_v35  ;;  %vm3132_vm15 = vcmp.eq.f32.partialorder %v1520_v49, 8.507059e+37 }
 0x539   : > { %1759 = vst [vmem:[%s3078_s29 + $0xa8] sm:$0xff] %v1727_v31  ;;  %v2033_v18 = vpop.eup %2032  ;;  %v1514_v4 = vmul.f32 %v2031_v34, %v1513_v51  ;;  %v1523_v54 = vor.u32 1.1754944e-38, %v1522_v9 }
 0x53a   : > { %v1639_v48 = vsel %vm1638_vm11, %v2029_v37, %v1635_v59  ;;  %v1527_v2 = vmul.f32 %v2033_v18, %v3111_v8  ;;  %v3138_v55 = vpop.xlane.xlu1 %1434  ;;  %vm1532_vm2 = vweird.f32 %v2033_v18 }
 0x53b   : > { %v1644_v60 = vsel %vm1641_vm12, %v1643_v36, %v1639_v48  ;;  %v2035_v0 = vpop.eup %2034  ;;  %v1515_v14 = vadd.f32 %v2031_v34, %v1514_v4  ;;  %2036 = vrcp.f32 %v3138_v55  ;;  %vm1533_vm4 = vmor %vm1531_vm0, %vm1532_vm2  ;;  %v1550_v44 = vand.u32 2147483647, %v3138_v55 }
 0x53c   : > { %v1728_v41 = vmul.f32 %v1644_v60, %v2971_v7  ;;  %v1729_v47 = vmul.f32 %v1644_v60, %v2973_v10  ;;  %v1528_v6 = vsub.f32 1.0, %v1527_v2  ;;  %v1647_v19 = vmul.f32 %v2035_v0, %v3118_v30  ;;  %v3148_v27 = vpop.xlane.xlu2 %1437 }
 0x53d   : > { %v1535_v7 = vand.u32 2147483647, %v3111_v8  ;;  %v1537_v10 = vand.u32 2147483648, %v3111_v8  ;;  %v1519_v43 = vsel %vm1518_vm1, %v2031_v34, %v1515_v14  ;;  %vm1652_vm3 = vweird.f32 %v2035_v0 }
 0x53e   : > { %1760 = vst [vmem:[%s3078_s29 + $0xb0] sm:$0xff] %v1728_v41  ;;  %v1529_v21 = vmul.f32 %v2033_v18, %v1528_v6  ;;  %v1648_v24 = vsub.f32 1.0, %v1647_v19  ;;  %v1524_v50 = vsel %vm3132_vm15, %v1523_v54, %v1519_v43  ;;  %2038 = vrcp.f32 %v3148_v27  ;;  %vm1653_vm7 = vmor %vm1651_vm6, %vm1652_vm3 }
 0x53f   : > { %1761 = vst [vmem:[%s3078_s29 + $0xb8] sm:$0xff] %v1729_v47  ;;  %v1712_v32 = vmul.f32 %v1524_v50, %v2983_v13  ;;  %v1713_v16 = vmul.f32 %v1524_v50, %v2985_v15  ;;  %v1538_v33 = vor.u32 1.1754944e-38, %v1537_v10  ;;  %vm1536_vm5 = vcmp.eq.f32.partialorder %v1535_v7, 8.507059e+37 }
 0x540   : > { %v1530_v37 = vadd.f32 %v2033_v18, %v1529_v21  ;;  %v1649_v17 = vmul.f32 %v2035_v0, %v1648_v24  ;;  %v1658_v13 = vor.u32 1.1754944e-38, %v1657_v63  ;;  %v1552_v49 = vand.u32 2147483648, %v3138_v55 }
 0x541   : > { %1744 = vst [vmem:[%s3078_s29 + $0x30] sm:$0xff] %v1712_v32  ;;  %v2037_v28 = vpop.eup %2036  ;;  %v1565_v9 = vand.u32 2147483647, %v3148_v27  ;;  %v1567_v36 = vand.u32 2147483648, %v3148_v27  ;;  %vm1546_vm10 = vweird.f32 %v3138_v55  ;;  %vm3183_vm11 = vcmp.eq.f32.partialorder %v1550_v44, 8.507059e+37 }
 0x542   : > { %v1534_v22 = vsel %vm1533_vm4, %v2033_v18, %v1530_v37  ;;  %v1650_v26 = vadd.f32 %v2035_v0, %v1649_v17  ;;  %1745 = vst [vmem:[%s3078_s29 + $0x38] sm:$0xff] %v1713_v16  ;;  %v1542_v31 = vmul.f32 %v2037_v28, %v3138_v55  ;;  %v3165_v52 = vpop.xlane.xlu1 %1461  ;;  %vm1547_vm9 = vweird.f32 %v2037_v28 }
 0x543   : > { %v1539_v40 = vsel %vm1536_vm5, %v1538_v33, %v1534_v22  ;;  %2040 = vrcp.f32 %v3165_v52  ;;  %vm1548_vm13 = vmor %vm1546_vm10, %vm1547_vm9  ;;  %v1553_v2 = vor.u32 1.1754944e-38, %v1552_v49  ;;  %vm1561_vm14 = vweird.f32 %v3148_v27 }
 0x544   : > { %v1714_v15 = vmul.f32 %v1539_v40, %v2999_v20  ;;  %v1715_v8 = vmul.f32 %v1539_v40, %v3001_v23  ;;  %v1654_v29 = vsel %vm1653_vm7, %v2035_v0, %v1650_v26  ;;  %v3167_v30 = vpop.xlane.xlu0 %1440  ;;  %v2039_v34 = vpop.eup %2038  ;;  %v1543_v56 = vsub.f32 1.0, %v1542_v31 }
 0x545   : > { %v1659_v35 = vsel %vm1656_vm8, %v1658_v13, %v1654_v29  ;;  %v1557_v59 = vmul.f32 %v2039_v34, %v3148_v27  ;;  %2042 = vrcp.f32 %v3167_v30  ;;  %vm1562_vm12 = vweird.f32 %v2039_v34 }
 0x546   : > { %1746 = vst [vmem:[%s3078_s29 + $0x40] sm:$0xff] %v1714_v15  ;;  %v1730_v20 = vmul.f32 %v1659_v35, %v3011_v25  ;;  %v1731_v23 = vmul.f32 %v1659_v35, %v3013_v5  ;;  %v1544_v51 = vmul.f32 %v2037_v28, %v1543_v56  ;;  %vm3191_vm15 = vcmp.eq.f32.partialorder %v1565_v9, 8.507059e+37  ;;  %vm1563_vm0 = vmor %vm1561_vm14, %vm1562_vm12 }
 0x547   : > { %1747 = vst [vmem:[%s3078_s29 + $0x48] sm:$0xff] %v1715_v8  ;;  %v1558_v18 = vsub.f32 1.0, %v1557_v59  ;;  %v1568_v41 = vor.u32 1.1754944e-38, %v1567_v36  ;;  %v1685_v14 = vand.u32 2147483647, %v3165_v52  ;;  %v1687_v7 = vand.u32 2147483648, %v3165_v52 }
 0x548   : > { %1762 = vst [vmem:[%s3078_s29 + $0xc0] sm:$0xff] %v1730_v20  ;;  %v1545_v48 = vadd.f32 %v2037_v28, %v1544_v51  ;;  %v1580_v10 = vand.u32 2147483647, %v3167_v30  ;;  %v1582_v63 = vand.u32 2147483648, %v3167_v30  ;;  %vm1681_vm2 = vweird.f32 %v3165_v52 }
 0x549   : > { %1763 = vst [vmem:[%s3078_s29 + $0xc8] sm:$0xff] %v1731_v23  ;;  %v1559_v60 = vmul.f32 %v2039_v34, %v1558_v18  ;;  %v2041_v4 = vpop.eup %2040  ;;  %vm1576_vm3 = vweird.f32 %v3167_v30  ;;  %vm1686_vm4 = vcmp.eq.f32.partialorder %v1685_v14, 8.507059e+37  ;;  %v1688_v22 = vor.u32 1.1754944e-38, %v1687_v7 }
 0x54a   : > { %v3187_v5 = vpop.xlane.xlu2 %1464  ;;  %v1549_v47 = vsel %vm1548_vm13, %v2037_v28, %v1545_v48  ;;  %v1677_v54 = vmul.f32 %v2041_v4, %v3165_v52  ;;  %vm1682_vm1 = vweird.f32 %v2041_v4  ;;  %vm3219_vm5 = vcmp.eq.f32.partialorder %v1580_v10, 8.507059e+37 }
 0x54b   : > { %2044 = vrcp.f32 %v3187_v5  ;;  %v1560_v61 = vadd.f32 %v2039_v34, %v1559_v60  ;;  %v2043_v19 = vpop.eup %2042  ;;  %v1554_v55 = vsel %vm3183_vm11, %v1553_v2, %v1549_v47  ;;  %vm1683_vm6 = vmor %vm1681_vm2, %vm1682_vm1  ;;  %v1702_v40 = vand.u32 2147483648, %v3187_v5 }
 0x54c   : > { %v3197_v6 = vpop.xlane.xlu0 %1458  ;;  %v1716_v62 = vmul.f32 %v1554_v55, %v3027_v12  ;;  %v1717_v43 = vmul.f32 %v1554_v55, %v3029_v53  ;;  %v1678_v24 = vsub.f32 1.0, %v1677_v54  ;;  %v1572_v50 = vmul.f32 %v2043_v19, %v3167_v30 }
 0x54d   : > { %2046 = vrcp.f32 %v3197_v6  ;;  %v1564_v21 = vsel %vm1563_vm0, %v2039_v34, %v1560_v61  ;;  %vm1577_vm7 = vweird.f32 %v2043_v19  ;;  %v1583_v15 = vor.u32 1.1754944e-38, %v1582_v63 }
 0x54e   : > { %v1569_v27 = vsel %vm3191_vm15, %v1568_v41, %v1564_v21  ;;  %1748 = vst [vmem:[%s3078_s29 + $0x50] sm:$0xff] %v1716_v62  ;;  %v1679_v12 = vmul.f32 %v2041_v4, %v1678_v24  ;;  %v1573_v53 = vsub.f32 1.0, %v1572_v50  ;;  %v1700_v8 = vand.u32 2147483647, %v3187_v5  ;;  %vm1578_vm9 = vmor %vm1576_vm3, %vm1577_vm7 }
 0x54f   : > { %v1718_v16 = vmul.f32 %v1569_v27, %v3035_v45  ;;  %v1719_v37 = vmul.f32 %v1569_v27, %v3037_v57  ;;  %1749 = vst [vmem:[%s3078_s29 + $0x58] sm:$0xff] %v1717_v43  ;;  %vm1696_vm10 = vweird.f32 %v3187_v5  ;;  %v1703_v59 = vor.u32 1.1754944e-38, %v1702_v40 }
 0x550   : > { %v1680_v33 = vadd.f32 %v2041_v4, %v1679_v12  ;;  %v1574_v57 = vmul.f32 %v2043_v19, %v1573_v53  ;;  %v1672_v49 = vand.u32 2147483648, %v3197_v6  ;;  %vm1701_vm13 = vcmp.eq.f32.partialorder %v1700_v8, 8.507059e+37 }
 0x551   : > { %v2045_v32 = vpop.eup %2044  ;;  %1750 = vst [vmem:[%s3078_s29 + $0x60] sm:$0xff] %v1718_v16  ;;  %vm1666_vm14 = vweird.f32 %v3197_v6 }
 0x552   : > { %v1692_v17 = vmul.f32 %v2045_v32, %v3187_v5  ;;  %1751 = vst [vmem:[%s3078_s29 + $0x68] sm:$0xff] %v1719_v37  ;;  %v1684_v13 = vsel %vm1683_vm6, %v2041_v4, %v1680_v33  ;;  %v1575_v52 = vadd.f32 %v2043_v19, %v1574_v57  ;;  %vm1697_vm8 = vweird.f32 %v2045_v32 }
 0x553   : > { %v2047_v45 = vpop.eup %2046  ;;  %v1689_v31 = vsel %vm1686_vm4, %v1688_v22, %v1684_v13  ;;  %vm1698_vm11 = vmor %vm1696_vm10, %vm1697_vm8 }
 0x554   : > { %v1693_v28 = vsub.f32 1.0, %v1692_v17  ;;  %v1662_v29 = vmul.f32 %v2047_v45, %v3197_v6  ;;  %v1734_v35 = vmul.f32 %v1689_v31, %v3045_v1  ;;  %v1735_v44 = vmul.f32 %v1689_v31, %v3047_v3 }
 0x555   : > { %v1579_v23 = vsel %vm1578_vm9, %v2043_v19, %v1575_v52  ;;  %vm1667_vm12 = vweird.f32 %v2047_v45  ;;  %v1670_v3 = vand.u32 2147483647, %v3197_v6 }
 0x556   : > { %v1694_v34 = vmul.f32 %v2045_v32, %v1693_v28  ;;  %v1663_v20 = vsub.f32 1.0, %v1662_v29  ;;  %1766 = vst [vmem:[%s3078_s29 + $0xe0] sm:$0xff] %v1734_v35  ;;  %v1584_v9 = vsel %vm3219_vm5, %v1583_v15, %v1579_v23  ;;  %vm1668_vm15 = vmor %vm1666_vm14, %vm1667_vm12 }
 0x557   : > { %1767 = vst [vmem:[%s3078_s29 + $0xe8] sm:$0xff] %v1735_v44  ;;  %v1720_v30 = vmul.f32 %v1584_v9, %v3049_v38  ;;  %v1721_v36 = vmul.f32 %v1584_v9, %v3051_v42  ;;  %v1673_v38 = vor.u32 1.1754944e-38, %v1672_v49  ;;  %vm1671_vm0 = vcmp.eq.f32.partialorder %v1670_v3, 8.507059e+37 }
 0x558   : > { %v1695_v56 = vadd.f32 %v2045_v32, %v1694_v34  ;;  %v1664_v1 = vmul.f32 %v2047_v45, %v1663_v20 }
 0x559   : > { %1752 = vst [vmem:[%s3078_s29 + $0x70] sm:$0xff] %v1720_v30 }
 0x55a   : > { %v1699_v51 = vsel %vm1698_vm11, %v2045_v32, %v1695_v56  ;;  %v1665_v25 = vadd.f32 %v2047_v45, %v1664_v1  ;;  %1753 = vst [vmem:[%s3078_s29 + $0x78] sm:$0xff] %v1721_v36 }
 0x55b   : > { %v1704_v18 = vsel %vm1701_vm13, %v1703_v59, %v1699_v51 }
 0x55c   : > { %v1736_v5 = vmul.f32 %v1704_v18, %v3061_v46  ;;  %v1737_v48 = vmul.f32 %v1704_v18, %v3063_v39  ;;  %v1669_v42 = vsel %vm1668_vm15, %v2047_v45, %v1665_v25 }
 0x55d   : > { %v1674_v60 = vsel %vm1671_vm0, %v1673_v38, %v1669_v42 }
 0x55e   : > { %1768 = vst [vmem:[%s3078_s29 + $0xf0] sm:$0xff] %v1736_v5  ;;  %v1732_v4 = vmul.f32 %v1674_v60, %v3067_v11  ;;  %v1733_v46 = vmul.f32 %v1674_v60, %v3069_v58 }
 0x55f   : > { %1769 = vst [vmem:[%s3078_s29 + $0xf8] sm:$0xff] %v1737_v48 }
 0x560   : > { %1764 = vst [vmem:[%s3078_s29 + $0xd0] sm:$0xff] %v1732_v4 }
 0x561   : > { %1765 = vst [vmem:[%s3078_s29 + $0xd8] sm:$0xff] %v1733_v46 }
 0x562   : > { %2105 = shalt.err (!%p2102_p7)
}
 0x563   : > { %s2149_s23 = smov 256   ;;  %s2150_s24 = smov 16  }
 0x564   : > { %1902 = dma.vmem_to_hbm [thread:$0]  (%p2199_p5), %s1785_s5, 4096, %s1787_s10, %s1771_s11, %s2149_s23, %s2149_s23, %s2150_s24  }
 0x565 PF: > { %p1914_p8 = scmp.ge.s32.totalorder %s2144_s9, 2  ;;  %s1801_s25 = sand.u32 1, %s2132_s6  }
 0x566   : > { %s1802_s26 = scalar_lea.sflag [#allocation4], %s1801_s25 }
 0x567   : > { %p1909_p9 = pnand %p1914_p8, %p2203_p6 }
 0x569   : > { %p1910_p10 = pneg %p1909_p9 }
 0x56b   : > { %2127 = dma.done.wait (%p1910_p10), %s1802_s26, 4096  }
 0x56c   : > { %2129 = vsyncadd (%p1910_p10), %s1802_s26, 4294963200  ;;  %p12_p11 = scmp.ge.s32.totalorder %s2186_s12, 4   ;;  %s3297_s6 = smov %s2136_s7 }
 0x56d   : > { %s3298_s7 = smov %s2140_s8  ;;  %s3299_s8 = smov %s2197_s15 }
 0x56e   : > { %s3300_s9 = smov %s2186_s12  ;;  %14 = sbr.rel (!%p12_p11) target bundleno = 4 (0x4), region = 62 }
 0x573   :  { %1808 = vsyncpa [#allocation3], 1 }
 0x574   :  { %1810 = vsyncpa [#allocation3 + $0x1], 1 }
 0x575   :  { %1811 = vsyncpa [#allocation4], 1 }
 0x576   :  { %1813 = vsyncpa [#allocation4 + $0x1], 1 }

</bundles_post_ra>
